<compile_context>
chip_gen: v7x
topology: tpu7x:2x2x1
jax: 0.10.0
libtpu: 0.0.40
codegen_flags: <defaults>
</compile_context>

<pallas_src>
import functools

import jax
import jax.numpy as jnp
from jax.experimental import pallas as pl
from jax.experimental.pallas import tpu as pltpu


def mlp_kernel(x_ref, w1_ref, b1_ref, wh_ref, bh_ref, w7_ref, b7_ref, o_ref,
               *, n_hidden):
    # Entire 7-layer MLP fused: all weights are tiny (<~0.5 MiB) and stay in VMEM.
    h = x_ref[...]                       # (tb, 128) in the compute dtype
    cd = h.dtype
    # layer 1 (input rows of W1 beyond feature 13 are zero-padded)
    h = jnp.maximum(
        jnp.dot(h, w1_ref[...], preferred_element_type=jnp.float32) + b1_ref[...],
        0.0).astype(cd)
    # hidden layers 2..6, packed into one (n_hidden, 128, 128) slab
    for l in range(n_hidden):
        h = jnp.maximum(
            jnp.dot(h, wh_ref[l], preferred_element_type=jnp.float32) + bh_ref[l],
            0.0).astype(cd)
    # final layer, zero-padded to 128 output lanes -> unmasked (tb, 128) store
    o_ref[...] = (
        jnp.dot(h, w7_ref[...], preferred_element_type=jnp.float32) + b7_ref[...]
    ).astype(o_ref.dtype)


def _round_up(x, m):
    return (x + m - 1) // m * m


def target_adjuster_forward(x, params, *, tb=256, compute_dtype=jnp.bfloat16):
    """x: (B, 13) float32. params: list of (W_in_out, b) pairs for the 7 layers.

    Computes x @ W + b per layer (equivalent to PyTorch x @ W.T with W (out,in)).
    Matmul operands are cast to `compute_dtype` (bf16 by default) with f32
    accumulation; batch and feature dims are zero-padded to lane-dense tiles and
    the padding is sliced off before returning.
    """
    LANE = 128
    B, F_in = x.shape
    n_hidden = len(params) - 2
    hidden = params[0][0].shape[1]           # 128
    F_out = params[-1][0].shape[1]           # 4

    # ---- batch / feature padding (lane-dense tiles) ----
    tb = min(tb, _round_up(B, LANE))         # whole (padded) batch in one step if small
    B_pad = _round_up(B, tb)
    F_in_pad = _round_up(F_in, LANE)
    F_out_pad = _round_up(F_out, LANE)

    x_p = jnp.zeros((B_pad, F_in_pad), compute_dtype)
    x_p = x_p.at[:B, :F_in].set(x.astype(compute_dtype))

    # layer 1: zero-pad W1's input rows to the padded feature width
    W1, b1 = params[0]
    w1_p = jnp.zeros((F_in_pad, hidden), compute_dtype)
    w1_p = w1_p.at[:F_in, :].set(W1.astype(compute_dtype))
    b1_p = b1.reshape(1, hidden).astype(jnp.float32)

    # hidden layers 2..6 packed into one slab each for weights / biases
    wh = jnp.stack([W.astype(compute_dtype) for W, _ in params[1:-1]])       # (5,128,128)
    bh = jnp.stack([b.reshape(1, hidden).astype(jnp.float32)
                    for _, b in params[1:-1]])                               # (5,1,128)

    # final layer: zero-pad output columns to a full lane width
    W7, b7 = params[-1]
    w7_p = jnp.zeros((hidden, F_out_pad), compute_dtype)
    w7_p = w7_p.at[:, :F_out].set(W7.astype(compute_dtype))
    b7_p = jnp.zeros((1, F_out_pad), jnp.float32)
    b7_p = b7_p.at[:, :F_out].set(b7.astype(jnp.float32).reshape(1, F_out))

    kernel = functools.partial(mlp_kernel, n_hidden=n_hidden)

    out = pl.pallas_call(
        kernel,
        out_shape=jax.ShapeDtypeStruct((B_pad, F_out_pad), jnp.float32),
        grid_spec=pltpu.PrefetchScalarGridSpec(
            num_scalar_prefetch=0,
            grid=(B_pad // tb,),
            in_specs=[
                pl.BlockSpec((tb, F_in_pad), lambda i: (i, 0)),               # x tile
                pl.BlockSpec((F_in_pad, hidden), lambda i: (0, 0)),           # W1
                pl.BlockSpec((1, hidden), lambda i: (0, 0)),                  # b1
                pl.BlockSpec((n_hidden, hidden, hidden), lambda i: (0, 0, 0)),# W2..W6
                pl.BlockSpec((n_hidden, 1, hidden), lambda i: (0, 0, 0)),     # b2..b6
                pl.BlockSpec((hidden, F_out_pad), lambda i: (0, 0)),          # W7 (padded)
                pl.BlockSpec((1, F_out_pad), lambda i: (0, 0)),               # b7 (padded)
            ],
            out_specs=pl.BlockSpec((tb, F_out_pad), lambda i: (i, 0)),
        ),
        compiler_params=pltpu.CompilerParams(
            dimension_semantics=("parallel",)),
    )(x_p, w1_p, b1_p, wh, bh, w7_p, b7_p)

    return out[:B, :F_out]


def init_linear(key, fan_in, fan_out):
    # Match PyTorch nn.Linear default init: U(-1/sqrt(fan_in), 1/sqrt(fan_in)).
    kw, kb = jax.random.split(key)
    bound = 1.0 / (fan_in ** 0.5)
    W = jax.random.uniform(kw, (fan_in, fan_out), jnp.float32, -bound, bound)
    b = jax.random.uniform(kb, (fan_out,), jnp.float32, -bound, bound)
    return W, b


def make_params(key):
    dims = [(13, 128), (128, 128), (128, 128), (128, 128),
            (128, 128), (128, 128), (128, 4)]
    keys = jax.random.split(key, len(dims))
    return [init_linear(k, fi, fo) for k, (fi, fo) in zip(keys, dims)]


def reference_forward(x, params):
    h = x
    for W, b in params[:-1]:
        h = jnp.maximum(h @ W + b, 0.0)
    W, b = params[-1]
    return h @ W + b


if __name__ == "__main__":
    key = jax.random.PRNGKey(0)
    k_params, k_x = jax.random.split(key)
    params = make_params(k_params)

    B = 16  # small batch; padded up to one lane-dense 128-row tile internally
    x = jax.random.normal(k_x, (B, 13), jnp.float32)

    ref = reference_forward(x, params)

    # f32 path: tight correctness check against the pure-JAX reference.
    out_f32 = jax.block_until_ready(
        target_adjuster_forward(x, params, compute_dtype=jnp.float32))
    assert out_f32.shape == (B, 4), out_f32.shape
    assert jnp.allclose(out_f32, ref, atol=1e-4, rtol=1e-4), "f32 mismatch vs reference"

    # bf16-operand / f32-accumulate fast path (the performance default).
    out_bf16 = jax.block_until_ready(target_adjuster_forward(x, params))
    assert out_bf16.shape == (B, 4), out_bf16.shape
    assert jnp.allclose(out_bf16, ref, atol=5e-2, rtol=5e-2), "bf16 mismatch vs reference"

    print("KERNEL_OK")
</pallas_src>

<mosaic_0001>
module attributes {stable_mosaic.version = 11 : i64} {
  func.func @mlp_kernel(%arg0: i32, %arg1: memref<128x128xf32, #tpu.memory_space<vmem>>, %arg2: memref<128x128xf32, #tpu.memory_space<vmem>>, %arg3: memref<1x128xf32, #tpu.memory_space<vmem>>, %arg4: memref<5x128x128xf32, #tpu.memory_space<vmem>>, %arg5: memref<5x1x128xf32, #tpu.memory_space<vmem>>, %arg6: memref<128x128xf32, #tpu.memory_space<vmem>>, %arg7: memref<1x128xf32, #tpu.memory_space<vmem>>, %arg8: memref<128x128xf32, #tpu.memory_space<vmem>>) attributes {dimension_semantics = [#tpu.dimension_semantics<parallel>], iteration_bounds = array<i64: 1>, scalar_prefetch = 0 : i64, scratch_operands = 0 : i64, tpu.core_type = #tpu.core_type<tc>, window_params = [{transform_indices = @transform_0, window_bounds = array<i64: 128, 128>}, {pipeline_mode = #tpu.pipeline_mode<synchronous>, transform_indices = @transform_1, window_bounds = array<i64: 128, 128>}, {pipeline_mode = #tpu.pipeline_mode<synchronous>, transform_indices = @transform_2, window_bounds = array<i64: 1, 128>}, {pipeline_mode = #tpu.pipeline_mode<synchronous>, transform_indices = @transform_3, window_bounds = array<i64: 5, 128, 128>}, {pipeline_mode = #tpu.pipeline_mode<synchronous>, transform_indices = @transform_4, window_bounds = array<i64: 5, 1, 128>}, {pipeline_mode = #tpu.pipeline_mode<synchronous>, transform_indices = @transform_5, window_bounds = array<i64: 128, 128>}, {pipeline_mode = #tpu.pipeline_mode<synchronous>, transform_indices = @transform_6, window_bounds = array<i64: 1, 128>}, {transform_indices = @transform_7, window_bounds = array<i64: 128, 128>}]} {
    %c0 = arith.constant 0 : index
    %c0_0 = arith.constant 0 : index
    %0 = vector.load %arg1[%c0, %c0_0] : memref<128x128xf32, #tpu.memory_space<vmem>>, vector<128x128xf32>
    %c0_1 = arith.constant 0 : index
    %c0_2 = arith.constant 0 : index
    %1 = vector.load %arg2[%c0_1, %c0_2] : memref<128x128xf32, #tpu.memory_space<vmem>>, vector<128x128xf32>
    %cst = arith.constant dense<0.000000e+00> : vector<128x128xf32>
    %2 = tpu.matmul %0, %1, %cst {dimension_numbers = #tpu.dot_dimension_numbers<[1], [0], [0], [1], [0, 0, 1, 1], [], []>} : vector<128x128xf32>, vector<128x128xf32>, vector<128x128xf32> -> vector<128x128xf32>
    %c0_3 = arith.constant 0 : index
    %c0_4 = arith.constant 0 : index
    %3 = vector.load %arg3[%c0_3, %c0_4] : memref<1x128xf32, #tpu.memory_space<vmem>>, vector<1x128xf32>
    %4 = vector.broadcast %3 : vector<1x128xf32> to vector<128x128xf32>
    %5 = arith.addf %2, %4 : vector<128x128xf32>
    %cst_5 = arith.constant 0.000000e+00 : f32
    %6 = vector.broadcast %cst_5 : f32 to vector<128x128xf32>
    %7 = arith.maximumf %5, %6 : vector<128x128xf32>
    %c0_6 = arith.constant 0 : index
    %c0_7 = arith.constant 0 : index
    %c0_8 = arith.constant 0 : index
    %8 = vector.load %arg4[%c0_6, %c0_7, %c0_8] : memref<5x128x128xf32, #tpu.memory_space<vmem>>, vector<1x128x128xf32>
    %9 = vector.shape_cast %8 : vector<1x128x128xf32> to vector<128x128xf32>
    %cst_9 = arith.constant dense<0.000000e+00> : vector<128x128xf32>
    %10 = tpu.matmul %7, %9, %cst_9 {dimension_numbers = #tpu.dot_dimension_numbers<[1], [0], [0], [1], [0, 0, 1, 1], [], []>} : vector<128x128xf32>, vector<128x128xf32>, vector<128x128xf32> -> vector<128x128xf32>
    %c0_10 = arith.constant 0 : index
    %c0_11 = arith.constant 0 : index
    %c0_12 = arith.constant 0 : index
    %11 = vector.load %arg5[%c0_10, %c0_11, %c0_12] : memref<5x1x128xf32, #tpu.memory_space<vmem>>, vector<1x1x128xf32>
    %12 = vector.shape_cast %11 : vector<1x1x128xf32> to vector<1x128xf32>
    %13 = vector.broadcast %12 : vector<1x128xf32> to vector<128x128xf32>
    %14 = arith.addf %10, %13 : vector<128x128xf32>
    %cst_13 = arith.constant 0.000000e+00 : f32
    %15 = vector.broadcast %cst_13 : f32 to vector<128x128xf32>
    %16 = arith.maximumf %14, %15 : vector<128x128xf32>
    %c1 = arith.constant 1 : index
    %c0_14 = arith.constant 0 : index
    %c0_15 = arith.constant 0 : index
    %17 = vector.load %arg4[%c1, %c0_14, %c0_15] : memref<5x128x128xf32, #tpu.memory_space<vmem>>, vector<1x128x128xf32>
    %18 = vector.shape_cast %17 : vector<1x128x128xf32> to vector<128x128xf32>
    %cst_16 = arith.constant dense<0.000000e+00> : vector<128x128xf32>
    %19 = tpu.matmul %16, %18, %cst_16 {dimension_numbers = #tpu.dot_dimension_numbers<[1], [0], [0], [1], [0, 0, 1, 1], [], []>} : vector<128x128xf32>, vector<128x128xf32>, vector<128x128xf32> -> vector<128x128xf32>
    %c1_17 = arith.constant 1 : index
    %c0_18 = arith.constant 0 : index
    %c0_19 = arith.constant 0 : index
    %20 = vector.load %arg5[%c1_17, %c0_18, %c0_19] : memref<5x1x128xf32, #tpu.memory_space<vmem>>, vector<1x1x128xf32>
    %21 = vector.shape_cast %20 : vector<1x1x128xf32> to vector<1x128xf32>
    %22 = vector.broadcast %21 : vector<1x128xf32> to vector<128x128xf32>
    %23 = arith.addf %19, %22 : vector<128x128xf32>
    %cst_20 = arith.constant 0.000000e+00 : f32
    %24 = vector.broadcast %cst_20 : f32 to vector<128x128xf32>
    %25 = arith.maximumf %23, %24 : vector<128x128xf32>
    %c2 = arith.constant 2 : index
    %c0_21 = arith.constant 0 : index
    %c0_22 = arith.constant 0 : index
    %26 = vector.load %arg4[%c2, %c0_21, %c0_22] : memref<5x128x128xf32, #tpu.memory_space<vmem>>, vector<1x128x128xf32>
    %27 = vector.shape_cast %26 : vector<1x128x128xf32> to vector<128x128xf32>
    %cst_23 = arith.constant dense<0.000000e+00> : vector<128x128xf32>
    %28 = tpu.matmul %25, %27, %cst_23 {dimension_numbers = #tpu.dot_dimension_numbers<[1], [0], [0], [1], [0, 0, 1, 1], [], []>} : vector<128x128xf32>, vector<128x128xf32>, vector<128x128xf32> -> vector<128x128xf32>
    %c2_24 = arith.constant 2 : index
    %c0_25 = arith.constant 0 : index
    %c0_26 = arith.constant 0 : index
    %29 = vector.load %arg5[%c2_24, %c0_25, %c0_26] : memref<5x1x128xf32, #tpu.memory_space<vmem>>, vector<1x1x128xf32>
    %30 = vector.shape_cast %29 : vector<1x1x128xf32> to vector<1x128xf32>
    %31 = vector.broadcast %30 : vector<1x128xf32> to vector<128x128xf32>
    %32 = arith.addf %28, %31 : vector<128x128xf32>
    %cst_27 = arith.constant 0.000000e+00 : f32
    %33 = vector.broadcast %cst_27 : f32 to vector<128x128xf32>
    %34 = arith.maximumf %32, %33 : vector<128x128xf32>
    %c3 = arith.constant 3 : index
    %c0_28 = arith.constant 0 : index
    %c0_29 = arith.constant 0 : index
    %35 = vector.load %arg4[%c3, %c0_28, %c0_29] : memref<5x128x128xf32, #tpu.memory_space<vmem>>, vector<1x128x128xf32>
    %36 = vector.shape_cast %35 : vector<1x128x128xf32> to vector<128x128xf32>
    %cst_30 = arith.constant dense<0.000000e+00> : vector<128x128xf32>
    %37 = tpu.matmul %34, %36, %cst_30 {dimension_numbers = #tpu.dot_dimension_numbers<[1], [0], [0], [1], [0, 0, 1, 1], [], []>} : vector<128x128xf32>, vector<128x128xf32>, vector<128x128xf32> -> vector<128x128xf32>
    %c3_31 = arith.constant 3 : index
    %c0_32 = arith.constant 0 : index
    %c0_33 = arith.constant 0 : index
    %38 = vector.load %arg5[%c3_31, %c0_32, %c0_33] : memref<5x1x128xf32, #tpu.memory_space<vmem>>, vector<1x1x128xf32>
    %39 = vector.shape_cast %38 : vector<1x1x128xf32> to vector<1x128xf32>
    %40 = vector.broadcast %39 : vector<1x128xf32> to vector<128x128xf32>
    %41 = arith.addf %37, %40 : vector<128x128xf32>
    %cst_34 = arith.constant 0.000000e+00 : f32
    %42 = vector.broadcast %cst_34 : f32 to vector<128x128xf32>
    %43 = arith.maximumf %41, %42 : vector<128x128xf32>
    %c4 = arith.constant 4 : index
    %c0_35 = arith.constant 0 : index
    %c0_36 = arith.constant 0 : index
    %44 = vector.load %arg4[%c4, %c0_35, %c0_36] : memref<5x128x128xf32, #tpu.memory_space<vmem>>, vector<1x128x128xf32>
    %45 = vector.shape_cast %44 : vector<1x128x128xf32> to vector<128x128xf32>
    %cst_37 = arith.constant dense<0.000000e+00> : vector<128x128xf32>
    %46 = tpu.matmul %43, %45, %cst_37 {dimension_numbers = #tpu.dot_dimension_numbers<[1], [0], [0], [1], [0, 0, 1, 1], [], []>} : vector<128x128xf32>, vector<128x128xf32>, vector<128x128xf32> -> vector<128x128xf32>
    %c4_38 = arith.constant 4 : index
    %c0_39 = arith.constant 0 : index
    %c0_40 = arith.constant 0 : index
    %47 = vector.load %arg5[%c4_38, %c0_39, %c0_40] : memref<5x1x128xf32, #tpu.memory_space<vmem>>, vector<1x1x128xf32>
    %48 = vector.shape_cast %47 : vector<1x1x128xf32> to vector<1x128xf32>
    %49 = vector.broadcast %48 : vector<1x128xf32> to vector<128x128xf32>
    %50 = arith.addf %46, %49 : vector<128x128xf32>
    %cst_41 = arith.constant 0.000000e+00 : f32
    %51 = vector.broadcast %cst_41 : f32 to vector<128x128xf32>
    %52 = arith.maximumf %50, %51 : vector<128x128xf32>
    %c0_42 = arith.constant 0 : index
    %c0_43 = arith.constant 0 : index
    %53 = vector.load %arg6[%c0_42, %c0_43] : memref<128x128xf32, #tpu.memory_space<vmem>>, vector<128x128xf32>
    %cst_44 = arith.constant dense<0.000000e+00> : vector<128x128xf32>
    %54 = tpu.matmul %52, %53, %cst_44 {dimension_numbers = #tpu.dot_dimension_numbers<[1], [0], [0], [1], [0, 0, 1, 1], [], []>} : vector<128x128xf32>, vector<128x128xf32>, vector<128x128xf32> -> vector<128x128xf32>
    %c0_45 = arith.constant 0 : index
    %c0_46 = arith.constant 0 : index
    %55 = vector.load %arg7[%c0_45, %c0_46] : memref<1x128xf32, #tpu.memory_space<vmem>>, vector<1x128xf32>
    %56 = vector.broadcast %55 : vector<1x128xf32> to vector<128x128xf32>
    %57 = arith.addf %54, %56 : vector<128x128xf32>
    %c0_47 = arith.constant 0 : index
    %c0_48 = arith.constant 0 : index
    %58 = vector.load %arg8[%c0_47, %c0_48] : memref<128x128xf32, #tpu.memory_space<vmem>>, vector<128x128xf32>
    tpu.vector_store %arg8[%c0_47, %c0_48], %57 {strides = array<i32>} : memref<128x128xf32, #tpu.memory_space<vmem>>, vector<128x128xf32>,
    return
  }
  func.func @transform_0(%arg0: i32) -> (i32, i32) {
    %c0_i32 = arith.constant 0 : i32
    %c0_i32_0 = arith.constant 0 : i32
    return %arg0, %c0_i32 : i32, i32
  }
  func.func @transform_1(%arg0: i32) -> (i32, i32) {
    %c0_i32 = arith.constant 0 : i32
    %c0_i32_0 = arith.constant 0 : i32
    %c0_i32_1 = arith.constant 0 : i32
    return %c0_i32, %c0_i32_0 : i32, i32
  }
  func.func @transform_2(%arg0: i32) -> (i32, i32) {
    %c0_i32 = arith.constant 0 : i32
    %c0_i32_0 = arith.constant 0 : i32
    %c0_i32_1 = arith.constant 0 : i32
    return %c0_i32, %c0_i32_0 : i32, i32
  }
  func.func @transform_3(%arg0: i32) -> (i32, i32, i32) {
    %c0_i32 = arith.constant 0 : i32
    %c0_i32_0 = arith.constant 0 : i32
    %c0_i32_1 = arith.constant 0 : i32
    %c0_i32_2 = arith.constant 0 : i32
    return %c0_i32, %c0_i32_0, %c0_i32_1 : i32, i32, i32
  }
  func.func @transform_4(%arg0: i32) -> (i32, i32, i32) {
    %c0_i32 = arith.constant 0 : i32
    %c0_i32_0 = arith.constant 0 : i32
    %c0_i32_1 = arith.constant 0 : i32
    %c0_i32_2 = arith.constant 0 : i32
    return %c0_i32, %c0_i32_0, %c0_i32_1 : i32, i32, i32
  }
  func.func @transform_5(%arg0: i32) -> (i32, i32) {
    %c0_i32 = arith.constant 0 : i32
    %c0_i32_0 = arith.constant 0 : i32
    %c0_i32_1 = arith.constant 0 : i32
    return %c0_i32, %c0_i32_0 : i32, i32
  }
  func.func @transform_6(%arg0: i32) -> (i32, i32) {
    %c0_i32 = arith.constant 0 : i32
    %c0_i32_0 = arith.constant 0 : i32
    %c0_i32_1 = arith.constant 0 : i32
    return %c0_i32, %c0_i32_0 : i32, i32
  }
  func.func @transform_7(%arg0: i32) -> (i32, i32) {
    %c0_i32 = arith.constant 0 : i32
    %c0_i32_0 = arith.constant 0 : i32
    return %arg0, %c0_i32 : i32, i32
  }
}

</mosaic_0001>

<bundles_post_ra>
// kernel: tpu_custom_call.1
= control target key start
LH: loop header
LB: loop body
LE: loop exit
PB: predicated region body
PF: predicated region fallthrough
CT: control target
= control target key end

     0   :  { %12 = vsyncpa [#allocation3], 0  ;;  %s2604_s0 = inlined_call_operand.hbm [shape: f32[128,128], index: 0, kind: input, shape index: {}]   ;;  %s2605_s1 = inlined_call_operand.hbm [shape: f32[128,128], index: 1, kind: input, shape index: {}]   ;;  %s2606_s2 = inlined_call_operand.vmem [shape: f32[1,128], index: 2, kind: input, shape index: {}]   ;;  %s2607_s3 = inlined_call_operand.hbm [shape: f32[5,128,128], index: 3, kind: input, shape index: {}]   ;;  %s2608_s4 = inlined_call_operand.vmem [shape: f32[5,1,128], index: 4, kind: input, shape index: {}]   ;;  %s2609_s5 = inlined_call_operand.hbm [shape: f32[128,128], index: 5, kind: input, shape index: {}]   ;;  %s2610_s6 = inlined_call_operand.vmem [shape: f32[1,128], index: 6, kind: input, shape index: {}]   ;;  %s2611_s7 = inlined_call_operand.hbm [shape: f32[128,128], index: 7, kind: output, shape index: {}]  }
   0x1   :  { %13 = vsyncpa [#allocation6], 0 }
   0x2   :  { %14 = vsyncpa [#allocation9], 0 }
   0x3   :  { %15 = vsyncpa [#allocation4], 0  ;;  %s2405_s24 = smov [#allocation5]   ;;  %s2406_s26 = smov [#allocation2]  }
   0x4   :  { %s33_s25 = sshll.u32 %s2405_s24, 4  ;;  %s21_s27 = sshll.u32 %s2406_s26, 4  ;;  %s34_s25 = int_to_ptr.vmem [resolvable:$true] %s33_s25  ;;  %s2452_s27 = int_to_ptr.vmem [resolvable:$true] %s21_s27 }
   0x5   :  { %s2287_s30 = scalar_lea.hbm %s2605_s1, 2048 }
   0x6   :  { %p2288_p0 = scmp.ne.s32.totalorder %s2605_s1, %s2287_s30  ;;  %p2291_p1 = scmp.lt.u32.totalorder %s2287_s30, %s2605_s1 }
   0x8   :  { %p2293_p2 = pnand %p2291_p1, %p2288_p0 }
   0xa   :  { %2296 = shalt.err (!%p2293_p2)
}
   0xb   :  { %s2297_s12 = scalar_lea.vmem %s34_s25, 2048  ;;  %p2302_p4 = scmp.lt.s32.totalorder %s34_s25, %s34_s25 }
   0xc   :  { %p2298_p3 = scmp.ne.s32.totalorder %s34_s25, %s2297_s12  ;;  %p2303_p5 = scmp.lt.s32.totalorder %s2297_s12, %s2297_s12 }
   0xe   :  { %p2304_p6 = por %p2303_p5, %p2302_p4 }
  0x10   :  { %p2305_p7 = pnand %p2304_p6, %p2298_p3 }
  0x12   :  { %2308 = shalt.err (!%p2305_p7)
}
  0x13   :  { %s2407_s13 = smov 128   ;;  %s2408_s14 = smov 8  }
  0x14   :  { %39 = dma.hbm_to_vmem [thread:$0]  %s2605_s1, 2048, %s34_s25, [#allocation6], %s2407_s13, %s2407_s13, %s2408_s14  }
  0x15   :  { %s2309_s19 = scalar_lea.hbm %s2604_s0, 2048 }
  0x16   :  { %p2310_p8 = scmp.ne.s32.totalorder %s2604_s0, %s2309_s19  ;;  %p2313_p9 = scmp.lt.u32.totalorder %s2309_s19, %s2604_s0 }
  0x18   :  { %p2315_p10 = pnand %p2313_p9, %p2310_p8 }
  0x1a   :  { %2318 = shalt.err (!%p2315_p10)
}
  0x1b   :  { %s2319_s24 = scalar_lea.vmem %s2452_s27, 2048  ;;  %p2324_p12 = scmp.lt.s32.totalorder %s2452_s27, %s2452_s27 }
  0x1c   :  { %p2320_p11 = scmp.ne.s32.totalorder %s2452_s27, %s2319_s24  ;;  %p2325_p13 = scmp.lt.s32.totalorder %s2319_s24, %s2319_s24 }
  0x1e   :  { %p2326_p0 = por %p2325_p13, %p2324_p12 }
  0x20   :  { %p2327_p1 = pnand %p2326_p0, %p2320_p11 }
  0x22   :  { %2330 = shalt.err (!%p2327_p1)
}
  0x23   :  { %27 = dma.hbm_to_vmem [thread:$0]  %s2604_s0, 2048, %s2452_s27, [#allocation3], %s2407_s13, %s2407_s13, %s2408_s14  }
  0x24   :  { %s2409_s26 = smov [#allocation7]   ;;  %s2410_s29 = smov [#allocation8]  }
  0x25   :  { %s47_s28 = sshll.u32 %s2409_s26, 4  ;;  %s61_s30 = sshll.u32 %s2410_s29, 4  ;;  %s48_s28 = int_to_ptr.vmem [resolvable:$true] %s47_s28  ;;  %s2489_s30 = int_to_ptr.vmem [resolvable:$true] %s61_s30 }
  0x26   :  { %s2331_s10 = scalar_lea.hbm %s2607_s3, 10240 }
  0x27   :  { %p2332_p2 = scmp.ne.s32.totalorder %s2607_s3, %s2331_s10  ;;  %p2335_p3 = scmp.lt.u32.totalorder %s2331_s10, %s2607_s3 }
  0x29   :  { %p2337_p4 = pnand %p2335_p3, %p2332_p2 }
  0x2b   :  { %2340 = shalt.err (!%p2337_p4)
}
  0x2c   :  { %s2341_s0 = scalar_lea.vmem %s48_s28, 10240  ;;  %p2346_p6 = scmp.lt.s32.totalorder %s48_s28, %s48_s28 }
  0x2d   :  { %p2342_p5 = scmp.ne.s32.totalorder %s48_s28, %s2341_s0  ;;  %p2347_p7 = scmp.lt.s32.totalorder %s2341_s0, %s2341_s0 }
  0x2f   :  { %p2348_p8 = por %p2347_p7, %p2346_p6 }
  0x31   :  { %p2349_p9 = pnand %p2348_p8, %p2342_p5 }
  0x33   :  { %2352 = shalt.err (!%p2349_p9)
}
  0x34   :  { %53 = dma.hbm_to_vmem [thread:$0]  %s2607_s3, 10240, %s48_s28, [#allocation6], %s2407_s13, %s2407_s13, %s2408_s14  }
  0x35   :  { %s2353_s20 = scalar_lea.hbm %s2609_s5, 2048 }
  0x36   :  { %p2354_p10 = scmp.ne.s32.totalorder %s2609_s5, %s2353_s20  ;;  %p2357_p11 = scmp.lt.u32.totalorder %s2353_s20, %s2609_s5 }
  0x38   :  { %p2359_p12 = pnand %p2357_p11, %p2354_p10 }
  0x3a   :  { %2362 = shalt.err (!%p2359_p12)
}
  0x3b   :  { %s2363_s1 = scalar_lea.vmem %s2489_s30, 2048  ;;  %p2368_p0 = scmp.lt.s32.totalorder %s2489_s30, %s2489_s30 }
  0x3c   :  { %p2364_p13 = scmp.ne.s32.totalorder %s2489_s30, %s2363_s1  ;;  %p2369_p1 = scmp.lt.s32.totalorder %s2363_s1, %s2363_s1 }
  0x3e   :  { %p2370_p2 = por %p2369_p1, %p2368_p0 }
  0x40   :  { %p2371_p3 = pnand %p2370_p2, %p2364_p13 }
  0x42   :  { %2374 = shalt.err (!%p2371_p3)
}
  0x43   :  { %67 = dma.hbm_to_vmem [thread:$0]  %s2609_s5, 2048, %s2489_s30, [#allocation9], %s2407_s13, %s2407_s13, %s2408_s14  }
  0x44   :  { %2397 = dma.done.wait [#allocation3], 2048  }
  0x45   :  { %2398 = vsyncadd [#allocation3], 4294965248 }
  0x46   :  { %2399 = dma.done.wait [#allocation6], 12288  }
  0x47   :  { %2400 = vsyncadd [#allocation6], 4294955008 }
  0x48   :  { %2401 = dma.done.wait [#allocation9], 2048  }
  0x49   :  { %2402 = vsyncadd [#allocation9], 4294965248  ;;  %v98_v0 = vld [vmem:[#allocation5] sm:$0xff]  ;;  %v99_v1 = vld [vmem:[#allocation5 + $0x8] sm:$0xff] }
  0x4a   :  { %v100_v2 = vld [vmem:[#allocation5 + $0x10] sm:$0xff]  ;;  %v2040_v3 = vpack.c.bf16 %v99_v1, %v98_v0  ;;  %v101_v4 = vld [vmem:[#allocation5 + $0x18] sm:$0xff]  ;;  %v102_v6 = vld [vmem:[#allocation5 + $0x20] sm:$0xff] }
  0x4b   :  { %v2044_v5 = vpack.c.bf16 %v101_v4, %v100_v2  ;;  %v103_v7 = vld [vmem:[#allocation5 + $0x28] sm:$0xff]  ;;  %v82_v9 = vld [vmem:[#allocation2] sm:$0xff]  ;;  %v104_v10 = vld [vmem:[#allocation5 + $0x30] sm:$0xff] }
  0x4c   :  { %2041 = vmatprep.subr.bf16.mxu0 %v2040_v3  ;;  %v2048_v8 = vpack.c.bf16 %v103_v7, %v102_v6  ;;  %v105_v11 = vld [vmem:[#allocation5 + $0x38] sm:$0xff]  ;;  %1680 = vmatprep.mubr.f32.mxu0 %v82_v9  ;;  %v106_v13 = vld [vmem:[#allocation5 + $0x40] sm:$0xff]  ;;  %v107_v14 = vld [vmem:[#allocation5 + $0x48] sm:$0xff] }
  0x4d   :  { %2043 = vmatpush3.bf16.msra.mxu0 %v2040_v3  ;;  %v2052_v12 = vpack.c.bf16 %v105_v11, %v104_v10  ;;  %v282_v15 = vld [vmem:[#allocation7] sm:$0xff]  ;;  %v283_v16 = vld [vmem:[#allocation7 + $0x8] sm:$0xff]  ;;  %v284_v17 = vld [vmem:[#allocation7 + $0x10] sm:$0xff]  ;;  %v2056_v21 = vpack.c.bf16 %v107_v14, %v106_v13 }
  0x4e   :  { %2045 = vmatprep.subr.bf16.mxu0 %v2044_v5  ;;  %v285_v18 = vld [vmem:[#allocation7 + $0x18] sm:$0xff]  ;;  %v2072_v19 = vpack.c.bf16 %v283_v16, %v282_v15  ;;  %v286_v22 = vld [vmem:[#allocation7 + $0x20] sm:$0xff]  ;;  %v287_v23 = vld [vmem:[#allocation7 + $0x28] sm:$0xff] }
  0x4f   :  { %v2076_v20 = vpack.c.bf16 %v285_v18, %v284_v17  ;;  %v108_v24 = vld [vmem:[#allocation5 + $0x50] sm:$0xff]  ;;  %v109_v25 = vld [vmem:[#allocation5 + $0x58] sm:$0xff]  ;;  %v2080_v26 = vpack.c.bf16 %v287_v23, %v286_v22  ;;  %v110_v30 = vld [vmem:[#allocation5 + $0x60] sm:$0xff] }
  0x50   :  { %2073 = vmatprep.subr.bf16.mxu1 %v2072_v19  ;;  %v2060_v27 = vpack.c.bf16 %v109_v25, %v108_v24  ;;  %v288_v28 = vld [vmem:[#allocation7 + $0x30] sm:$0xff]  ;;  %v289_v29 = vld [vmem:[#allocation7 + $0x38] sm:$0xff]  ;;  %v111_v31 = vld [vmem:[#allocation5 + $0x68] sm:$0xff] }
  0x51   :  { %2047 = vmatpush3.bf16.msra.mxu0 %v2044_v5  ;;  %2075 = vmatpush3.bf16.msra.mxu1 %v2072_v19  ;;  %v2084_v32 = vpack.c.bf16 %v289_v29, %v288_v28  ;;  %v2064_v33 = vpack.c.bf16 %v111_v31, %v110_v30  ;;  %v290_v34 = vld [vmem:[#allocation7 + $0x40] sm:$0xff]  ;;  %v291_v35 = vld [vmem:[#allocation7 + $0x48] sm:$0xff]  ;;  %v112_v36 = vld [vmem:[#allocation5 + $0x70] sm:$0xff] }
  0x52   :  { %2049 = vmatprep.subr.bf16.mxu0 %v2048_v8  ;;  %2077 = vmatprep.subr.bf16.mxu1 %v2076_v20  ;;  %v113_v37 = vld [vmem:[#allocation5 + $0x78] sm:$0xff]  ;;  %v2088_v38 = vpack.c.bf16 %v291_v35, %v290_v34  ;;  %v292_v40 = vld [vmem:[#allocation7 + $0x50] sm:$0xff]  ;;  %v294_v43 = vld [vmem:[#allocation7 + $0x60] sm:$0xff] }
  0x53   :  { %v2068_v39 = vpack.c.bf16 %v113_v37, %v112_v36  ;;  %v293_v41 = vld [vmem:[#allocation7 + $0x58] sm:$0xff]  ;;  %v295_v44 = vld [vmem:[#allocation7 + $0x68] sm:$0xff]  ;;  %v84_v47 = vld [vmem:[#allocation2 + $0x10] sm:$0xff] }
  0x54   :  { %v2092_v42 = vpack.c.bf16 %v293_v41, %v292_v40  ;;  %v83_v45 = vld [vmem:[#allocation2 + $0x8] sm:$0xff]  ;;  %v2096_v46 = vpack.c.bf16 %v295_v44, %v294_v43  ;;  %v85_v48 = vld [vmem:[#allocation2 + $0x18] sm:$0xff]  ;;  %v86_v49 = vld [vmem:[#allocation2 + $0x20] sm:$0xff] }
  0x55   :  { %2051 = vmatpush3.bf16.msra.mxu0 %v2048_v8  ;;  %2079 = vmatpush3.bf16.msra.mxu1 %v2076_v20  ;;  %v87_v50 = vld [vmem:[#allocation2 + $0x28] sm:$0xff]  ;;  %v88_v51 = vld [vmem:[#allocation2 + $0x30] sm:$0xff]  ;;  %v89_v52 = vld [vmem:[#allocation2 + $0x38] sm:$0xff] }
  0x56   :  { %2053 = vmatprep.subr.bf16.mxu0 %v2052_v12  ;;  %2081 = vmatprep.subr.bf16.mxu1 %v2080_v26  ;;  %v90_v53 = vld [vmem:[#allocation2 + $0x40] sm:$0xff]  ;;  %v91_v54 = vld [vmem:[#allocation2 + $0x48] sm:$0xff]  ;;  %v92_v55 = vld [vmem:[#allocation2 + $0x50] sm:$0xff] }
  0x57   :  { %v93_v56 = vld [vmem:[#allocation2 + $0x58] sm:$0xff]  ;;  %v94_v57 = vld [vmem:[#allocation2 + $0x60] sm:$0xff]  ;;  %v95_v58 = vld [vmem:[#allocation2 + $0x68] sm:$0xff] }
  0x58   :  { %v96_v59 = vld [vmem:[#allocation2 + $0x70] sm:$0xff]  ;;  %v97_v60 = vld [vmem:[#allocation2 + $0x78] sm:$0xff]  ;;  %v467_v0 = vld [vmem:[#allocation7 + $0x80] sm:$0xff] }
  0x59   :  { %2055 = vmatpush3.bf16.msra.mxu0 %v2052_v12  ;;  %2083 = vmatpush3.bf16.msra.mxu1 %v2080_v26  ;;  %v296_v61 = vld [vmem:[#allocation7 + $0x70] sm:$0xff]  ;;  %v297_v62 = vld [vmem:[#allocation7 + $0x78] sm:$0xff]  ;;  %v468_v1 = vld [vmem:[#allocation7 + $0x88] sm:$0xff] }
  0x5a   :  { %2057 = vmatprep.subr.bf16.mxu0 %v2056_v21  ;;  %2085 = vmatprep.subr.bf16.mxu1 %v2084_v32  ;;  %v2100_v63 = vpack.c.bf16 %v297_v62, %v296_v61  ;;  %v469_v2 = vld [vmem:[#allocation7 + $0x90] sm:$0xff]  ;;  %v2104_v3 = vpack.c.bf16 %v468_v1, %v467_v0  ;;  %v470_v4 = vld [vmem:[#allocation7 + $0x98] sm:$0xff]  ;;  %v471_v6 = vld [vmem:[#allocation7 + $0xa0] sm:$0xff] }
  0x5b   :  { %v2108_v5 = vpack.c.bf16 %v470_v4, %v469_v2  ;;  %v472_v7 = vld [vmem:[#allocation7 + $0xa8] sm:$0xff]  ;;  %v473_v9 = vld [vmem:[#allocation7 + $0xb0] sm:$0xff]  ;;  %v474_v10 = vld [vmem:[#allocation7 + $0xb8] sm:$0xff] }
  0x5c   :  { %v2112_v8 = vpack.c.bf16 %v472_v7, %v471_v6  ;;  %v2116_v11 = vpack.c.bf16 %v474_v10, %v473_v9  ;;  %v475_v12 = vld [vmem:[#allocation7 + $0xc0] sm:$0xff]  ;;  %v476_v13 = vld [vmem:[#allocation7 + $0xc8] sm:$0xff]  ;;  %v477_v15 = vld [vmem:[#allocation7 + $0xd0] sm:$0xff] }
  0x5d   :  { %2059 = vmatpush3.bf16.msra.mxu0 %v2056_v21  ;;  %2087 = vmatpush3.bf16.msra.mxu1 %v2084_v32  ;;  %v2120_v14 = vpack.c.bf16 %v476_v13, %v475_v12  ;;  %v478_v16 = vld [vmem:[#allocation7 + $0xd8] sm:$0xff]  ;;  %v479_v18 = vld [vmem:[#allocation7 + $0xe0] sm:$0xff]  ;;  %v480_v19 = vld [vmem:[#allocation7 + $0xe8] sm:$0xff] }
  0x5e   :  { %2061 = vmatprep.subr.bf16.mxu0 %v2060_v27  ;;  %2089 = vmatprep.subr.bf16.mxu1 %v2088_v38  ;;  %v2124_v17 = vpack.c.bf16 %v478_v16, %v477_v15  ;;  %v2128_v20 = vpack.c.bf16 %v480_v19, %v479_v18  ;;  %v1413_v21 = vld [vmem:[%s2606_s2] ss:$0 sm:$0xff]  ;;  %v481_v6 = vld [vmem:[#allocation7 + $0xf0] sm:$0xff]  ;;  %v482_v7 = vld [vmem:[#allocation7 + $0xf8] sm:$0xff] }
  0x5f   :  { %v653_v9 = vld [vmem:[#allocation7 + $0x100] sm:$0xff]  ;;  %v654_v10 = vld [vmem:[#allocation7 + $0x108] sm:$0xff]  ;;  %v656_v13 = vld [vmem:[#allocation7 + $0x118] sm:$0xff] }
  0x60   :  { %v2136_v12 = vpack.c.bf16 %v654_v10, %v653_v9  ;;  %v657_v15 = vld [vmem:[#allocation7 + $0x120] sm:$0xff]  ;;  %v658_v16 = vld [vmem:[#allocation7 + $0x128] sm:$0xff]  ;;  %v659_v18 = vld [vmem:[#allocation7 + $0x130] sm:$0xff] }
  0x61   :  { %2063 = vmatpush3.bf16.msra.mxu0 %v2060_v27  ;;  %2091 = vmatpush3.bf16.msra.mxu1 %v2088_v38  ;;  %v660_v19 = vld [vmem:[#allocation7 + $0x138] sm:$0xff] }
  0x62   :  { %2065 = vmatprep.subr.bf16.mxu0 %v2064_v33  ;;  %2093 = vmatprep.subr.bf16.mxu1 %v2092_v42 }
  0x65   :  { %2067 = vmatpush3.bf16.msra.mxu0 %v2064_v33  ;;  %2095 = vmatpush3.bf16.msra.mxu1 %v2092_v42 }
  0x66   :  { %2069 = vmatprep.subr.bf16.mxu0 %v2068_v39  ;;  %2097 = vmatprep.subr.bf16.mxu1 %v2096_v46 }
  0x69   :  { %2071 = vmatpush3.bf16.msra.mxu0 %v2068_v39  ;;  %2099 = vmatpush3.bf16.msra.mxu1 %v2096_v46 }
  0x6a   :  { %2101 = vmatprep.subr.bf16.mxu1 %v2100_v63  ;;  %2105 = vmatprep.subr.bf16.mxu0 %v2104_v3 }
  0x6c   :  { %1681 = vmatmul.mubr.f32.vlgmr.msra.gmra.mrb[0].mxu0 %v83_v45 }
  0x6d   :  { %1683 = vmatprep.mubr.f32.mxu0 %v84_v47  ;;  %2103 = vmatpush3.bf16.msra.mxu1 %v2100_v63 }
  0x6e   :  { %2107 = vmatpush3.bf16.msra.mxu0 %v2104_v3  ;;  %2137 = vmatprep.subr.bf16.mxu1 %v2136_v12 }
  0x6f   :  { %2109 = vmatprep.subr.bf16.mxu0 %v2108_v5 }
  0x70   :  { %1684 = vmatmul.mubr.f32.gmra.mrb[2].mxu0 %v85_v48 }
  0x71   :  { %1686 = vmatprep.mubr.f32.mxu0 %v86_v49 }
  0x72   :  { %2111 = vmatpush3.bf16.msra.mxu0 %v2108_v5 }
  0x73   :  { %2113 = vmatprep.subr.bf16.mxu0 %v2112_v8 }
  0x74   :  { %1687 = vmatmul.mubr.f32.gmra.mrb[4].mxu0 %v87_v50 }
  0x75   :  { %1689 = vmatprep.mubr.f32.mxu0 %v88_v51 }
  0x76   :  { %2115 = vmatpush3.bf16.msra.mxu0 %v2112_v8  ;;  %v2132_v8 = vpack.c.bf16 %v482_v7, %v481_v6 }
  0x77   :  { %2117 = vmatprep.subr.bf16.mxu0 %v2116_v11 }
  0x78   :  { %1690 = vmatmul.mubr.f32.gmra.mrb[6].mxu0 %v89_v52 }
  0x79   :  { %1692 = vmatprep.mubr.f32.mxu0 %v90_v53 }
  0x7a   :  { %2119 = vmatpush3.bf16.msra.mxu0 %v2116_v11  ;;  %v655_v11 = vld [vmem:[#allocation7 + $0x110] sm:$0xff] }
  0x7b   :  { %2121 = vmatprep.subr.bf16.mxu0 %v2120_v14 }
  0x7c   :  { %1693 = vmatmul.mubr.f32.gmra.mrb[8].mxu0 %v91_v54 }
  0x7d   :  { %1695 = vmatprep.mubr.f32.mxu0 %v92_v55 }
  0x7e   :  { %2123 = vmatpush3.bf16.msra.mxu0 %v2120_v14  ;;  %v2140_v14 = vpack.c.bf16 %v656_v13, %v655_v11 }
  0x7f   :  { %2125 = vmatprep.subr.bf16.mxu0 %v2124_v17 }
  0x80   :  { %1696 = vmatmul.mubr.f32.gmra.mrb[10].mxu0 %v93_v56 }
  0x81   :  { %1698 = vmatprep.mubr.f32.mxu0 %v94_v57 }
  0x82   :  { %2127 = vmatpush3.bf16.msra.mxu0 %v2124_v17  ;;  %v2144_v17 = vpack.c.bf16 %v658_v16, %v657_v15  ;;  %v667_v15 = vld [vmem:[#allocation7 + $0x170] sm:$0xff]  ;;  %v668_v16 = vld [vmem:[#allocation7 + $0x178] sm:$0xff] }
  0x83   :  { %2129 = vmatprep.subr.bf16.mxu0 %v2128_v20 }
  0x84   :  { %1699 = vmatmul.mubr.f32.gmra.mrb[12].mxu0 %v95_v58 }
  0x85   :  { %1701 = vmatprep.mubr.f32.mxu0 %v96_v59 }
  0x86   :  { %2131 = vmatpush3.bf16.msra.mxu0 %v2128_v20  ;;  %v2148_v20 = vpack.c.bf16 %v660_v19, %v659_v18  ;;  %v839_v18 = vld [vmem:[#allocation7 + $0x180] sm:$0xff]  ;;  %v840_v19 = vld [vmem:[#allocation7 + $0x188] sm:$0xff] }
  0x87   :  { %2133 = vmatprep.subr.bf16.mxu0 %v2132_v8 }
  0x88   :  { %1702 = vmatmul.mubr.f32.gmra.mrb[14].mxu0 %v97_v60 }
  0x8a   :  { %2135 = vmatpush3.bf16.msra.mxu0 %v2132_v8 }
 0x13f   :  { %v1682_v22 = vpop.f32.mrb[0].mxu0 }
 0x140   :  { %v193_v23 = vadd.f32 %v1682_v22, %v1413_v21  ;;  %v187_v24 = vpop.f32.mrb[1].mxu0  ;;  %v662_v22 = vld [vmem:[#allocation7 + $0x148] sm:$0xff] }
 0x141   :  { %v188_v25 = vadd.f32 %v1413_v21, %v187_v24  ;;  %v663_v24 = vld [vmem:[#allocation7 + $0x150] sm:$0xff] }
 0x142   :  { %v267_v28 = vmax.f32 %v193_v23, 0.0 }
 0x143   :  { %v1685_v26 = vpop.f32.mrb[2].mxu0  ;;  %v266_v27 = vmax.f32 %v188_v25, 0.0  ;;  %v664_v25 = vld [vmem:[#allocation7 + $0x158] sm:$0xff] }
 0x144   :  { %v203_v29 = vadd.f32 %v1685_v26, %v1413_v21  ;;  %v197_v30 = vpop.f32.mrb[3].mxu0  ;;  %v2156_v26 = vpack.c.bf16 %v664_v25, %v663_v24  ;;  %v843_v24 = vld [vmem:[#allocation7 + $0x1a0] sm:$0xff]  ;;  %v844_v25 = vld [vmem:[#allocation7 + $0x1a8] sm:$0xff] }
 0x145   :  { %v198_v31 = vadd.f32 %v1413_v21, %v197_v30  ;;  %1736 = vmatprep.mubr.f32.mxu1 %v266_v27  ;;  %v665_v27 = vld [vmem:[#allocation7 + $0x160] sm:$0xff] }
 0x146   :  { %1737 = vmatmul.mubr.f32.vlgmr.msra.gmra.mrb[0].mxu1 %v267_v28  ;;  %v269_v34 = vmax.f32 %v203_v29, 0.0  ;;  %v666_v28 = vld [vmem:[#allocation7 + $0x168] sm:$0xff]  ;;  %v1414_v30 = vld [vmem:[%s2608_s4] ss:$0 sm:$0xff] }
 0x147   :  { %v268_v32 = vmax.f32 %v198_v31, 0.0  ;;  %v1688_v33 = vpop.f32.mrb[4].mxu0  ;;  %2139 = vmatpush3.bf16.msra.mxu1 %v2136_v12  ;;  %v2160_v29 = vpack.c.bf16 %v666_v28, %v665_v27  ;;  %v845_v27 = vld [vmem:[#allocation7 + $0x1b0] sm:$0xff]  ;;  %v846_v28 = vld [vmem:[#allocation7 + $0x1b8] sm:$0xff] }
 0x148   :  { %v213_v35 = vadd.f32 %v1688_v33, %v1413_v21  ;;  %v207_v36 = vpop.f32.mrb[5].mxu0  ;;  %2141 = vmatprep.subr.bf16.mxu1 %v2140_v14 }
 0x149   :  { %v208_v37 = vadd.f32 %v1413_v21, %v207_v36  ;;  %1739 = vmatprep.mubr.f32.mxu1 %v268_v32 }
 0x14a   :  { %1740 = vmatmul.mubr.f32.gmra.mrb[2].mxu1 %v269_v34  ;;  %v271_v40 = vmax.f32 %v213_v35, 0.0 }
 0x14b   :  { %v270_v38 = vmax.f32 %v208_v37, 0.0  ;;  %v1691_v39 = vpop.f32.mrb[6].mxu0  ;;  %2143 = vmatpush3.bf16.msra.mxu1 %v2140_v14 }
 0x14c   :  { %v223_v41 = vadd.f32 %v1691_v39, %v1413_v21  ;;  %v217_v42 = vpop.f32.mrb[7].mxu0  ;;  %2145 = vmatprep.subr.bf16.mxu1 %v2144_v17 }
 0x14d   :  { %v218_v43 = vadd.f32 %v1413_v21, %v217_v42  ;;  %1742 = vmatprep.mubr.f32.mxu1 %v270_v38 }
 0x14e   :  { %1743 = vmatmul.mubr.f32.gmra.mrb[4].mxu1 %v271_v40  ;;  %v273_v46 = vmax.f32 %v223_v41, 0.0 }
 0x14f   :  { %v272_v44 = vmax.f32 %v218_v43, 0.0  ;;  %v1694_v45 = vpop.f32.mrb[8].mxu0  ;;  %2147 = vmatpush3.bf16.msra.mxu1 %v2144_v17  ;;  %v2164_v17 = vpack.c.bf16 %v668_v16, %v667_v15 }
 0x150   :  { %v233_v47 = vadd.f32 %v1694_v45, %v1413_v21  ;;  %v227_v48 = vpop.f32.mrb[9].mxu0  ;;  %2149 = vmatprep.subr.bf16.mxu1 %v2148_v20 }
 0x151   :  { %v228_v49 = vadd.f32 %v1413_v21, %v227_v48  ;;  %1745 = vmatprep.mubr.f32.mxu1 %v272_v44 }
 0x152   :  { %1746 = vmatmul.mubr.f32.gmra.mrb[6].mxu1 %v273_v46  ;;  %v275_v52 = vmax.f32 %v233_v47, 0.0 }
 0x153   :  { %v274_v50 = vmax.f32 %v228_v49, 0.0  ;;  %v1697_v51 = vpop.f32.mrb[10].mxu0  ;;  %2151 = vmatpush3.bf16.msra.mxu1 %v2148_v20  ;;  %v841_v20 = vld [vmem:[#allocation7 + $0x190] sm:$0xff] }
 0x154   :  { %v243_v53 = vadd.f32 %v1697_v51, %v1413_v21  ;;  %v237_v54 = vpop.f32.mrb[11].mxu0 }
 0x155   :  { %v238_v55 = vadd.f32 %v1413_v21, %v237_v54  ;;  %1748 = vmatprep.mubr.f32.mxu1 %v274_v50 }
 0x156   :  { %1749 = vmatmul.mubr.f32.gmra.mrb[8].mxu1 %v275_v52  ;;  %v277_v58 = vmax.f32 %v243_v53, 0.0 }
 0x157   :  { %v276_v56 = vmax.f32 %v238_v55, 0.0  ;;  %v1700_v57 = vpop.f32.mrb[12].mxu0 }
 0x158   :  { %v253_v59 = vadd.f32 %v1700_v57, %v1413_v21  ;;  %v247_v60 = vpop.f32.mrb[13].mxu0 }
 0x159   :  { %v248_v61 = vadd.f32 %v1413_v21, %v247_v60  ;;  %1751 = vmatprep.mubr.f32.mxu1 %v276_v56 }
 0x15a   :  { %1752 = vmatmul.mubr.f32.gmra.mrb[10].mxu1 %v277_v58  ;;  %v279_v0 = vmax.f32 %v253_v59, 0.0 }
 0x15b   :  { %v278_v62 = vmax.f32 %v248_v61, 0.0  ;;  %v1703_v63 = vpop.f32.mrb[14].mxu0 }
 0x15c   :  { %v263_v1 = vadd.f32 %v1703_v63, %v1413_v21  ;;  %v257_v2 = vpop.f32.mrb[15].mxu0 }
 0x15d   :  { %v258_v3 = vadd.f32 %v1413_v21, %v257_v2  ;;  %1754 = vmatprep.mubr.f32.mxu1 %v278_v62  ;;  %v661_v21 = vld [vmem:[#allocation7 + $0x140] sm:$0xff] }
 0x15e   :  { %1755 = vmatmul.mubr.f32.gmra.mrb[12].mxu1 %v279_v0  ;;  %v281_v5 = vmax.f32 %v263_v1, 0.0  ;;  %v2152_v23 = vpack.c.bf16 %v662_v22, %v661_v21  ;;  %v2168_v21 = vpack.c.bf16 %v840_v19, %v839_v18  ;;  %v842_v22 = vld [vmem:[#allocation7 + $0x198] sm:$0xff] }
 0x15f   :  { %v280_v4 = vmax.f32 %v258_v3, 0.0 }
 0x160   :  { %2153 = vmatprep.subr.bf16.mxu1 %v2152_v23  ;;  %2169 = vmatprep.subr.bf16.mxu0 %v2168_v21 }
 0x161   :  { %1757 = vmatprep.mubr.f32.mxu1 %v280_v4  ;;  %2155 = vmatpush3.bf16.msra.mxu1 %v2152_v23  ;;  %v2172_v23 = vpack.c.bf16 %v842_v22, %v841_v20 }
 0x162   :  { %1758 = vmatmul.mubr.f32.gmra.mrb[14].mxu1 %v281_v5  ;;  %2157 = vmatprep.subr.bf16.mxu1 %v2156_v26 }
 0x165   :  { %2159 = vmatpush3.bf16.msra.mxu1 %v2156_v26  ;;  %v2176_v26 = vpack.c.bf16 %v844_v25, %v843_v24  ;;  %v853_v24 = vld [vmem:[#allocation7 + $0x1f0] sm:$0xff]  ;;  %v854_v25 = vld [vmem:[#allocation7 + $0x1f8] sm:$0xff] }
 0x166   :  { %2161 = vmatprep.subr.bf16.mxu1 %v2160_v29 }
 0x169   :  { %2163 = vmatpush3.bf16.msra.mxu1 %v2160_v29  ;;  %v2180_v29 = vpack.c.bf16 %v846_v28, %v845_v27  ;;  %v1025_v27 = vld [vmem:[#allocation7 + $0x200] sm:$0xff]  ;;  %v1026_v28 = vld [vmem:[#allocation7 + $0x208] sm:$0xff] }
 0x16a   :  { %2165 = vmatprep.subr.bf16.mxu1 %v2164_v17 }
 0x16d   :  { %2167 = vmatpush3.bf16.msra.mxu1 %v2164_v17 }
 0x219   :  { %v1738_v31 = vpop.f32.mrb[0].mxu1 }
 0x21a   :  { %v377_v32 = vadd.f32 %v1738_v31, %v1414_v30  ;;  %v371_v33 = vpop.f32.mrb[1].mxu1  ;;  %v848_v31 = vld [vmem:[#allocation7 + $0x1c8] sm:$0xff] }
 0x21b   :  { %v372_v34 = vadd.f32 %v1414_v30, %v371_v33  ;;  %v849_v33 = vld [vmem:[#allocation7 + $0x1d0] sm:$0xff] }
 0x21c   :  { %v451_v37 = vmax.f32 %v377_v32, 0.0 }
 0x21d   :  { %v450_v35 = vmax.f32 %v372_v34, 0.0  ;;  %v1741_v36 = vpop.f32.mrb[2].mxu1  ;;  %v850_v34 = vld [vmem:[#allocation7 + $0x1d8] sm:$0xff] }
 0x21e   :  { %v387_v38 = vadd.f32 %v1741_v36, %v1414_v30  ;;  %v381_v39 = vpop.f32.mrb[3].mxu1  ;;  %v851_v36 = vld [vmem:[#allocation7 + $0x1e0] sm:$0xff] }
 0x21f   :  { %v382_v40 = vadd.f32 %v1414_v30, %v381_v39  ;;  %1792 = vmatprep.mubr.f32.mxu0 %v450_v35  ;;  %v2188_v35 = vpack.c.bf16 %v850_v34, %v849_v33  ;;  %v1416_v39 = vld [vmem:[%s2608_s4 + $0x1] ss:$0 sm:$0xff]  ;;  %v1030_v34 = vld [vmem:[#allocation7 + $0x228] sm:$0xff] }
 0x220   :  { %1793 = vmatmul.mubr.f32.vlgmr.msra.gmra.mrb[16].mxu0 %v451_v37  ;;  %v453_v43 = vmax.f32 %v387_v38, 0.0  ;;  %v852_v37 = vld [vmem:[#allocation7 + $0x1e8] sm:$0xff]  ;;  %v1029_v33 = vld [vmem:[#allocation7 + $0x220] sm:$0xff] }
 0x221   :  { %v452_v41 = vmax.f32 %v382_v40, 0.0  ;;  %v1744_v42 = vpop.f32.mrb[4].mxu1  ;;  %2171 = vmatpush3.bf16.msra.mxu0 %v2168_v21  ;;  %v2192_v38 = vpack.c.bf16 %v852_v37, %v851_v36  ;;  %v1031_v36 = vld [vmem:[#allocation7 + $0x230] sm:$0xff]  ;;  %v1032_v37 = vld [vmem:[#allocation7 + $0x238] sm:$0xff] }
 0x222   :  { %v397_v44 = vadd.f32 %v1744_v42, %v1414_v30  ;;  %v391_v45 = vpop.f32.mrb[5].mxu1  ;;  %2173 = vmatprep.subr.bf16.mxu0 %v2172_v23 }
 0x223   :  { %v392_v46 = vadd.f32 %v1414_v30, %v391_v45  ;;  %1795 = vmatprep.mubr.f32.mxu0 %v452_v41 }
 0x224   :  { %1796 = vmatmul.mubr.f32.gmra.mrb[18].mxu0 %v453_v43  ;;  %v455_v49 = vmax.f32 %v397_v44, 0.0 }
 0x225   :  { %v454_v47 = vmax.f32 %v392_v46, 0.0  ;;  %v1747_v48 = vpop.f32.mrb[6].mxu1  ;;  %2175 = vmatpush3.bf16.msra.mxu0 %v2172_v23 }
 0x226   :  { %v407_v50 = vadd.f32 %v1747_v48, %v1414_v30  ;;  %v401_v51 = vpop.f32.mrb[7].mxu1  ;;  %2177 = vmatprep.subr.bf16.mxu0 %v2176_v26 }
 0x227   :  { %v402_v52 = vadd.f32 %v1414_v30, %v401_v51  ;;  %1798 = vmatprep.mubr.f32.mxu0 %v454_v47 }
 0x228   :  { %1799 = vmatmul.mubr.f32.gmra.mrb[20].mxu0 %v455_v49  ;;  %v457_v55 = vmax.f32 %v407_v50, 0.0 }
 0x229   :  { %v456_v53 = vmax.f32 %v402_v52, 0.0  ;;  %v1750_v54 = vpop.f32.mrb[8].mxu1  ;;  %2179 = vmatpush3.bf16.msra.mxu0 %v2176_v26  ;;  %v2196_v26 = vpack.c.bf16 %v854_v25, %v853_v24 }
 0x22a   :  { %v417_v56 = vadd.f32 %v1750_v54, %v1414_v30  ;;  %v411_v57 = vpop.f32.mrb[9].mxu1  ;;  %2181 = vmatprep.subr.bf16.mxu0 %v2180_v29 }
 0x22b   :  { %v412_v58 = vadd.f32 %v1414_v30, %v411_v57  ;;  %1801 = vmatprep.mubr.f32.mxu0 %v456_v53 }
 0x22c   :  { %1802 = vmatmul.mubr.f32.gmra.mrb[22].mxu0 %v457_v55  ;;  %v459_v61 = vmax.f32 %v417_v56, 0.0 }
 0x22d   :  { %v458_v59 = vmax.f32 %v412_v58, 0.0  ;;  %v1753_v60 = vpop.f32.mrb[10].mxu1  ;;  %2183 = vmatpush3.bf16.msra.mxu0 %v2180_v29  ;;  %v1027_v29 = vld [vmem:[#allocation7 + $0x210] sm:$0xff] }
 0x22e   :  { %v427_v62 = vadd.f32 %v1753_v60, %v1414_v30  ;;  %v421_v63 = vpop.f32.mrb[11].mxu1 }
 0x22f   :  { %v422_v0 = vadd.f32 %v1414_v30, %v421_v63  ;;  %1804 = vmatprep.mubr.f32.mxu0 %v458_v59 }
 0x230   :  { %1805 = vmatmul.mubr.f32.gmra.mrb[24].mxu0 %v459_v61  ;;  %v461_v3 = vmax.f32 %v427_v62, 0.0 }
 0x231   :  { %v460_v1 = vmax.f32 %v422_v0, 0.0  ;;  %v1756_v2 = vpop.f32.mrb[12].mxu1 }
 0x232   :  { %v437_v4 = vadd.f32 %v1756_v2, %v1414_v30  ;;  %v431_v5 = vpop.f32.mrb[13].mxu1 }
 0x233   :  { %v432_v6 = vadd.f32 %v1414_v30, %v431_v5  ;;  %1807 = vmatprep.mubr.f32.mxu0 %v460_v1 }
 0x234   :  { %1808 = vmatmul.mubr.f32.gmra.mrb[26].mxu0 %v461_v3  ;;  %v463_v9 = vmax.f32 %v437_v4, 0.0 }
 0x235   :  { %v462_v7 = vmax.f32 %v432_v6, 0.0  ;;  %v1759_v8 = vpop.f32.mrb[14].mxu1 }
 0x236   :  { %v447_v10 = vadd.f32 %v1759_v8, %v1414_v30  ;;  %v441_v11 = vpop.f32.mrb[15].mxu1 }
 0x237   :  { %v442_v12 = vadd.f32 %v1414_v30, %v441_v11  ;;  %1810 = vmatprep.mubr.f32.mxu0 %v462_v7  ;;  %v847_v30 = vld [vmem:[#allocation7 + $0x1c0] sm:$0xff] }
 0x238   :  { %1811 = vmatmul.mubr.f32.gmra.mrb[28].mxu0 %v463_v9  ;;  %v465_v14 = vmax.f32 %v447_v10, 0.0  ;;  %v2184_v32 = vpack.c.bf16 %v848_v31, %v847_v30  ;;  %v2200_v30 = vpack.c.bf16 %v1026_v28, %v1025_v27  ;;  %v1028_v31 = vld [vmem:[#allocation7 + $0x218] sm:$0xff] }
 0x239   :  { %v464_v13 = vmax.f32 %v442_v12, 0.0 }
 0x23a   :  { %2185 = vmatprep.subr.bf16.mxu0 %v2184_v32  ;;  %2201 = vmatprep.subr.bf16.mxu1 %v2200_v30 }
 0x23b   :  { %1813 = vmatprep.mubr.f32.mxu0 %v464_v13  ;;  %2187 = vmatpush3.bf16.msra.mxu0 %v2184_v32  ;;  %v2204_v32 = vpack.c.bf16 %v1028_v31, %v1027_v29 }
 0x23c   :  { %1814 = vmatmul.mubr.f32.gmra.mrb[30].mxu0 %v465_v14  ;;  %2189 = vmatprep.subr.bf16.mxu0 %v2188_v35 }
 0x23f   :  { %2191 = vmatpush3.bf16.msra.mxu0 %v2188_v35  ;;  %v2208_v35 = vpack.c.bf16 %v1030_v34, %v1029_v33  ;;  %v1039_v33 = vld [vmem:[#allocation7 + $0x270] sm:$0xff]  ;;  %v1040_v34 = vld [vmem:[#allocation7 + $0x278] sm:$0xff] }
 0x240   :  { %2193 = vmatprep.subr.bf16.mxu0 %v2192_v38 }
 0x243   :  { %2195 = vmatpush3.bf16.msra.mxu0 %v2192_v38  ;;  %v2212_v38 = vpack.c.bf16 %v1032_v37, %v1031_v36  ;;  %v1210_v36 = vld [vmem:[#allocation8] sm:$0xff]  ;;  %v1211_v37 = vld [vmem:[#allocation8 + $0x8] sm:$0xff] }
 0x244   :  { %2197 = vmatprep.subr.bf16.mxu0 %v2196_v26 }
 0x247   :  { %2199 = vmatpush3.bf16.msra.mxu0 %v2196_v26 }
 0x2f3   :  { %v1794_v40 = vpop.f32.mrb[16].mxu0 }
 0x2f4   :  { %v563_v41 = vadd.f32 %v1794_v40, %v1416_v39  ;;  %v557_v42 = vpop.f32.mrb[17].mxu0  ;;  %v1034_v40 = vld [vmem:[#allocation7 + $0x248] sm:$0xff] }
 0x2f5   :  { %v558_v43 = vadd.f32 %v1416_v39, %v557_v42  ;;  %v1035_v42 = vld [vmem:[#allocation7 + $0x250] sm:$0xff] }
 0x2f6   :  { %v637_v46 = vmax.f32 %v563_v41, 0.0 }
 0x2f7   :  { %v636_v44 = vmax.f32 %v558_v43, 0.0  ;;  %v1797_v45 = vpop.f32.mrb[18].mxu0  ;;  %v1036_v43 = vld [vmem:[#allocation7 + $0x258] sm:$0xff] }
 0x2f8   :  { %v573_v47 = vadd.f32 %v1797_v45, %v1416_v39  ;;  %v567_v48 = vpop.f32.mrb[19].mxu0  ;;  %v1037_v45 = vld [vmem:[#allocation7 + $0x260] sm:$0xff] }
 0x2f9   :  { %v568_v49 = vadd.f32 %v1416_v39, %v567_v48  ;;  %1848 = vmatprep.mubr.f32.mxu1 %v636_v44  ;;  %v2220_v44 = vpack.c.bf16 %v1036_v43, %v1035_v42  ;;  %v1418_v48 = vld [vmem:[%s2608_s4 + $0x2] ss:$0 sm:$0xff]  ;;  %v1215_v43 = vld [vmem:[#allocation8 + $0x28] sm:$0xff] }
 0x2fa   :  { %1849 = vmatmul.mubr.f32.vlgmr.msra.gmra.mrb[16].mxu1 %v637_v46  ;;  %v639_v52 = vmax.f32 %v573_v47, 0.0  ;;  %v1038_v46 = vld [vmem:[#allocation7 + $0x268] sm:$0xff]  ;;  %v1214_v42 = vld [vmem:[#allocation8 + $0x20] sm:$0xff] }
 0x2fb   :  { %v638_v50 = vmax.f32 %v568_v49, 0.0  ;;  %v1800_v51 = vpop.f32.mrb[20].mxu0  ;;  %2203 = vmatpush3.bf16.msra.mxu1 %v2200_v30  ;;  %v2224_v47 = vpack.c.bf16 %v1038_v46, %v1037_v45  ;;  %v1216_v45 = vld [vmem:[#allocation8 + $0x30] sm:$0xff]  ;;  %v1217_v46 = vld [vmem:[#allocation8 + $0x38] sm:$0xff] }
 0x2fc   :  { %v583_v53 = vadd.f32 %v1800_v51, %v1416_v39  ;;  %v577_v54 = vpop.f32.mrb[21].mxu0  ;;  %2205 = vmatprep.subr.bf16.mxu1 %v2204_v32 }
 0x2fd   :  { %v578_v55 = vadd.f32 %v1416_v39, %v577_v54  ;;  %1851 = vmatprep.mubr.f32.mxu1 %v638_v50 }
 0x2fe   :  { %1852 = vmatmul.mubr.f32.gmra.mrb[18].mxu1 %v639_v52  ;;  %v641_v58 = vmax.f32 %v583_v53, 0.0 }
 0x2ff   :  { %v640_v56 = vmax.f32 %v578_v55, 0.0  ;;  %v1803_v57 = vpop.f32.mrb[22].mxu0  ;;  %2207 = vmatpush3.bf16.msra.mxu1 %v2204_v32 }
 0x300   :  { %v593_v59 = vadd.f32 %v1803_v57, %v1416_v39  ;;  %v587_v60 = vpop.f32.mrb[23].mxu0  ;;  %2209 = vmatprep.subr.bf16.mxu1 %v2208_v35 }
 0x301   :  { %v588_v61 = vadd.f32 %v1416_v39, %v587_v60  ;;  %1854 = vmatprep.mubr.f32.mxu1 %v640_v56 }
 0x302   :  { %1855 = vmatmul.mubr.f32.gmra.mrb[20].mxu1 %v641_v58  ;;  %v643_v0 = vmax.f32 %v593_v59, 0.0 }
 0x303   :  { %v642_v62 = vmax.f32 %v588_v61, 0.0  ;;  %v1806_v63 = vpop.f32.mrb[24].mxu0  ;;  %2211 = vmatpush3.bf16.msra.mxu1 %v2208_v35  ;;  %v2228_v35 = vpack.c.bf16 %v1040_v34, %v1039_v33 }
 0x304   :  { %v603_v1 = vadd.f32 %v1806_v63, %v1416_v39  ;;  %v597_v2 = vpop.f32.mrb[25].mxu0  ;;  %2213 = vmatprep.subr.bf16.mxu1 %v2212_v38 }
 0x305   :  { %v598_v3 = vadd.f32 %v1416_v39, %v597_v2  ;;  %1857 = vmatprep.mubr.f32.mxu1 %v642_v62 }
 0x306   :  { %1858 = vmatmul.mubr.f32.gmra.mrb[22].mxu1 %v643_v0  ;;  %v645_v6 = vmax.f32 %v603_v1, 0.0 }
 0x307   :  { %v644_v4 = vmax.f32 %v598_v3, 0.0  ;;  %v1809_v5 = vpop.f32.mrb[26].mxu0  ;;  %2215 = vmatpush3.bf16.msra.mxu1 %v2212_v38  ;;  %v1212_v38 = vld [vmem:[#allocation8 + $0x10] sm:$0xff] }
 0x308   :  { %v613_v7 = vadd.f32 %v1809_v5, %v1416_v39  ;;  %v607_v8 = vpop.f32.mrb[27].mxu0 }
 0x309   :  { %v608_v9 = vadd.f32 %v1416_v39, %v607_v8  ;;  %1860 = vmatprep.mubr.f32.mxu1 %v644_v4 }
 0x30a   :  { %1861 = vmatmul.mubr.f32.gmra.mrb[24].mxu1 %v645_v6  ;;  %v647_v12 = vmax.f32 %v613_v7, 0.0 }
 0x30b   :  { %v646_v10 = vmax.f32 %v608_v9, 0.0  ;;  %v1812_v11 = vpop.f32.mrb[28].mxu0 }
 0x30c   :  { %v623_v13 = vadd.f32 %v1812_v11, %v1416_v39  ;;  %v617_v14 = vpop.f32.mrb[29].mxu0 }
 0x30d   :  { %v618_v15 = vadd.f32 %v1416_v39, %v617_v14  ;;  %1863 = vmatprep.mubr.f32.mxu1 %v646_v10 }
 0x30e   :  { %1864 = vmatmul.mubr.f32.gmra.mrb[26].mxu1 %v647_v12  ;;  %v649_v18 = vmax.f32 %v623_v13, 0.0 }
 0x30f   :  { %v648_v16 = vmax.f32 %v618_v15, 0.0  ;;  %v1815_v17 = vpop.f32.mrb[30].mxu0 }
 0x310   :  { %v633_v19 = vadd.f32 %v1815_v17, %v1416_v39  ;;  %v627_v20 = vpop.f32.mrb[31].mxu0 }
 0x311   :  { %v628_v21 = vadd.f32 %v1416_v39, %v627_v20  ;;  %1866 = vmatprep.mubr.f32.mxu1 %v648_v16  ;;  %v1033_v39 = vld [vmem:[#allocation7 + $0x240] sm:$0xff] }
 0x312   :  { %1867 = vmatmul.mubr.f32.gmra.mrb[28].mxu1 %v649_v18  ;;  %v651_v23 = vmax.f32 %v633_v19, 0.0  ;;  %v2216_v41 = vpack.c.bf16 %v1034_v40, %v1033_v39  ;;  %v2232_v39 = vpack.c.bf16 %v1211_v37, %v1210_v36  ;;  %v1213_v40 = vld [vmem:[#allocation8 + $0x18] sm:$0xff] }
 0x313   :  { %v650_v22 = vmax.f32 %v628_v21, 0.0 }
 0x314   :  { %2217 = vmatprep.subr.bf16.mxu1 %v2216_v41  ;;  %2233 = vmatprep.subr.bf16.mxu0 %v2232_v39 }
 0x315   :  { %1869 = vmatprep.mubr.f32.mxu1 %v650_v22  ;;  %2219 = vmatpush3.bf16.msra.mxu1 %v2216_v41  ;;  %v2236_v41 = vpack.c.bf16 %v1213_v40, %v1212_v38 }
 0x316   :  { %1870 = vmatmul.mubr.f32.gmra.mrb[30].mxu1 %v651_v23  ;;  %2221 = vmatprep.subr.bf16.mxu1 %v2220_v44 }
 0x319   :  { %2223 = vmatpush3.bf16.msra.mxu1 %v2220_v44  ;;  %v2240_v44 = vpack.c.bf16 %v1215_v43, %v1214_v42  ;;  %v1224_v42 = vld [vmem:[#allocation8 + $0x70] sm:$0xff]  ;;  %v1225_v43 = vld [vmem:[#allocation8 + $0x78] sm:$0xff] }
 0x31a   :  { %2225 = vmatprep.subr.bf16.mxu1 %v2224_v47 }
 0x31d   :  { %2227 = vmatpush3.bf16.msra.mxu1 %v2224_v47  ;;  %v2538_v47 = vpack.c.bf16 %v1217_v46, %v1216_v45  ;;  %v1422_v45 = vld [vmem:[%s2608_s4 + $0x4] ss:$0 sm:$0xff] }
 0x31e   :  { %2229 = vmatprep.subr.bf16.mxu1 %v2228_v35 }
 0x321   :  { %2231 = vmatpush3.bf16.msra.mxu1 %v2228_v35 }
 0x322   :  { %2264 = vmatprep.subr.bf16.mxu1 %v2232_v39 }
 0x3cd   :  { %v1850_v49 = vpop.f32.mrb[16].mxu1 }
 0x3ce   :  { %v749_v50 = vadd.f32 %v1850_v49, %v1418_v48  ;;  %v743_v51 = vpop.f32.mrb[17].mxu1  ;;  %v1219_v49 = vld [vmem:[#allocation8 + $0x48] sm:$0xff] }
 0x3cf   :  { %v744_v52 = vadd.f32 %v1418_v48, %v743_v51  ;;  %v1220_v51 = vld [vmem:[#allocation8 + $0x50] sm:$0xff] }
 0x3d0   :  { %v823_v55 = vmax.f32 %v749_v50, 0.0 }
 0x3d1   :  { %v822_v53 = vmax.f32 %v744_v52, 0.0  ;;  %v1853_v54 = vpop.f32.mrb[18].mxu1  ;;  %v1221_v52 = vld [vmem:[#allocation8 + $0x58] sm:$0xff] }
 0x3d2   :  { %v759_v56 = vadd.f32 %v1853_v54, %v1418_v48  ;;  %v753_v57 = vpop.f32.mrb[19].mxu1  ;;  %v1222_v54 = vld [vmem:[#allocation8 + $0x60] sm:$0xff] }
 0x3d3   :  { %v754_v58 = vadd.f32 %v1418_v48, %v753_v57  ;;  %1904 = vmatprep.mubr.f32.mxu0 %v822_v53  ;;  %v2545_v53 = vpack.c.bf16 %v1221_v52, %v1220_v51  ;;  %v2557_v57 = vld [vmem:[%s2608_s4 + $0x3] ss:$0 sm:$0xff] }
 0x3d4   :  { %1905 = vmatmul.mubr.f32.vlgmr.msra.gmra.mrb[32].mxu0 %v823_v55  ;;  %v825_v61 = vmax.f32 %v759_v56, 0.0  ;;  %v1223_v55 = vld [vmem:[#allocation8 + $0x68] sm:$0xff] }
 0x3d5   :  { %v824_v59 = vmax.f32 %v754_v58, 0.0  ;;  %v1856_v60 = vpop.f32.mrb[20].mxu1  ;;  %2235 = vmatpush3.bf16.msra.mxu0 %v2232_v39  ;;  %v2549_v56 = vpack.c.bf16 %v1223_v55, %v1222_v54 }
 0x3d6   :  { %v769_v62 = vadd.f32 %v1856_v60, %v1418_v48  ;;  %v763_v63 = vpop.f32.mrb[21].mxu1  ;;  %2237 = vmatprep.subr.bf16.mxu0 %v2236_v41 }
 0x3d7   :  { %v764_v0 = vadd.f32 %v1418_v48, %v763_v63  ;;  %1907 = vmatprep.mubr.f32.mxu0 %v824_v59 }
 0x3d8   :  { %1908 = vmatmul.mubr.f32.gmra.mrb[34].mxu0 %v825_v61  ;;  %v827_v3 = vmax.f32 %v769_v62, 0.0 }
 0x3d9   :  { %v826_v1 = vmax.f32 %v764_v0, 0.0  ;;  %v1859_v2 = vpop.f32.mrb[22].mxu1  ;;  %2239 = vmatpush3.bf16.msra.mxu0 %v2236_v41 }
 0x3da   :  { %v779_v4 = vadd.f32 %v1859_v2, %v1418_v48  ;;  %v773_v5 = vpop.f32.mrb[23].mxu1  ;;  %2241 = vmatprep.subr.bf16.mxu0 %v2240_v44 }
 0x3db   :  { %v774_v6 = vadd.f32 %v1418_v48, %v773_v5  ;;  %1910 = vmatprep.mubr.f32.mxu0 %v826_v1 }
 0x3dc   :  { %1911 = vmatmul.mubr.f32.gmra.mrb[36].mxu0 %v827_v3  ;;  %v829_v9 = vmax.f32 %v779_v4, 0.0 }
 0x3dd   :  { %v828_v7 = vmax.f32 %v774_v6, 0.0  ;;  %v1862_v8 = vpop.f32.mrb[24].mxu1  ;;  %2243 = vmatpush3.bf16.msra.mxu0 %v2240_v44 }
 0x3de   :  { %v789_v10 = vadd.f32 %v1862_v8, %v1418_v48  ;;  %v783_v11 = vpop.f32.mrb[25].mxu1  ;;  %2245 = vmatprep.subr.bf16.mxu0 %v2538_v47 }
 0x3df   :  { %v784_v12 = vadd.f32 %v1418_v48, %v783_v11  ;;  %1913 = vmatprep.mubr.f32.mxu0 %v828_v7 }
 0x3e0   :  { %1914 = vmatmul.mubr.f32.gmra.mrb[38].mxu0 %v829_v9  ;;  %v831_v15 = vmax.f32 %v789_v10, 0.0 }
 0x3e1   :  { %v830_v13 = vmax.f32 %v784_v12, 0.0  ;;  %v1865_v14 = vpop.f32.mrb[26].mxu1  ;;  %2247 = vmatpush3.bf16.msra.mxu0 %v2538_v47 }
 0x3e2   :  { %v799_v16 = vadd.f32 %v1865_v14, %v1418_v48  ;;  %v793_v17 = vpop.f32.mrb[27].mxu1 }
 0x3e3   :  { %v794_v18 = vadd.f32 %v1418_v48, %v793_v17  ;;  %1916 = vmatprep.mubr.f32.mxu0 %v830_v13 }
 0x3e4   :  { %1917 = vmatmul.mubr.f32.gmra.mrb[40].mxu0 %v831_v15  ;;  %v833_v21 = vmax.f32 %v799_v16, 0.0 }
 0x3e5   :  { %v832_v19 = vmax.f32 %v794_v18, 0.0  ;;  %v1868_v20 = vpop.f32.mrb[28].mxu1 }
 0x3e6   :  { %v809_v22 = vadd.f32 %v1868_v20, %v1418_v48  ;;  %v803_v23 = vpop.f32.mrb[29].mxu1 }
 0x3e7   :  { %v804_v24 = vadd.f32 %v1418_v48, %v803_v23  ;;  %1919 = vmatprep.mubr.f32.mxu0 %v832_v19 }
 0x3e8   :  { %1920 = vmatmul.mubr.f32.gmra.mrb[42].mxu0 %v833_v21  ;;  %v835_v27 = vmax.f32 %v809_v22, 0.0 }
 0x3e9   :  { %v834_v25 = vmax.f32 %v804_v24, 0.0  ;;  %v1871_v26 = vpop.f32.mrb[30].mxu1 }
 0x3ea   :  { %v819_v28 = vadd.f32 %v1871_v26, %v1418_v48  ;;  %v813_v29 = vpop.f32.mrb[31].mxu1 }
 0x3eb   :  { %v814_v30 = vadd.f32 %v1418_v48, %v813_v29  ;;  %1922 = vmatprep.mubr.f32.mxu0 %v834_v25  ;;  %v1218_v48 = vld [vmem:[#allocation8 + $0x40] sm:$0xff] }
 0x3ec   :  { %1923 = vmatmul.mubr.f32.gmra.mrb[44].mxu0 %v835_v27  ;;  %v837_v32 = vmax.f32 %v819_v28, 0.0  ;;  %v2541_v50 = vpack.c.bf16 %v1219_v49, %v1218_v48 }
 0x3ed   :  { %v836_v31 = vmax.f32 %v814_v30, 0.0 }
 0x3ee   :  { %2249 = vmatprep.subr.bf16.mxu0 %v2541_v50 }
 0x3ef   :  { %1925 = vmatprep.mubr.f32.mxu0 %v836_v31  ;;  %2251 = vmatpush3.bf16.msra.mxu0 %v2541_v50 }
 0x3f0   :  { %1926 = vmatmul.mubr.f32.gmra.mrb[46].mxu0 %v837_v32  ;;  %2253 = vmatprep.subr.bf16.mxu0 %v2545_v53 }
 0x3f3   :  { %2255 = vmatpush3.bf16.msra.mxu0 %v2545_v53 }
 0x3f4   :  { %2257 = vmatprep.subr.bf16.mxu0 %v2549_v56 }
 0x3f7   :  { %2259 = vmatpush3.bf16.msra.mxu0 %v2549_v56 }
 0x4a7   :  { %v1906_v58 = vpop.f32.mrb[32].mxu0 }
 0x4a8   :  { %v935_v59 = vadd.f32 %v1906_v58, %v2557_v57  ;;  %v929_v60 = vpop.f32.mrb[33].mxu0 }
 0x4a9   :  { %v930_v61 = vadd.f32 %v2557_v57, %v929_v60 }
 0x4aa   :  { %v1009_v0 = vmax.f32 %v935_v59, 0.0 }
 0x4ab   :  { %v1008_v62 = vmax.f32 %v930_v61, 0.0  ;;  %v1909_v63 = vpop.f32.mrb[34].mxu0 }
 0x4ac   :  { %v945_v1 = vadd.f32 %v1909_v63, %v2557_v57  ;;  %v939_v2 = vpop.f32.mrb[35].mxu0 }
 0x4ad   :  { %v940_v3 = vadd.f32 %v2557_v57, %v939_v2  ;;  %1960 = vmatprep.mubr.f32.mxu1 %v1008_v62 }
 0x4ae   :  { %1961 = vmatmul.mubr.f32.vlgmr.msra.gmra.mrb[32].mxu1 %v1009_v0  ;;  %v1011_v6 = vmax.f32 %v945_v1, 0.0 }
 0x4af   :  { %v1010_v4 = vmax.f32 %v940_v3, 0.0  ;;  %v1912_v5 = vpop.f32.mrb[36].mxu0  ;;  %2272 = vmatpush3.bf16.msra.mxu1 %v2232_v39 }
 0x4b0   :  { %v955_v7 = vadd.f32 %v1912_v5, %v2557_v57  ;;  %v949_v8 = vpop.f32.mrb[37].mxu0  ;;  %2265 = vmatprep.subr.bf16.mxu1 %v2236_v41 }
 0x4b1   :  { %v950_v9 = vadd.f32 %v2557_v57, %v949_v8  ;;  %1963 = vmatprep.mubr.f32.mxu1 %v1010_v4 }
 0x4b2   :  { %1964 = vmatmul.mubr.f32.gmra.mrb[34].mxu1 %v1011_v6  ;;  %v1013_v12 = vmax.f32 %v955_v7, 0.0 }
 0x4b3   :  { %v1012_v10 = vmax.f32 %v950_v9, 0.0  ;;  %v1915_v11 = vpop.f32.mrb[38].mxu0  ;;  %2273 = vmatpush3.bf16.msra.mxu1 %v2236_v41 }
 0x4b4   :  { %v965_v13 = vadd.f32 %v1915_v11, %v2557_v57  ;;  %v959_v14 = vpop.f32.mrb[39].mxu0  ;;  %2266 = vmatprep.subr.bf16.mxu1 %v2240_v44 }
 0x4b5   :  { %v960_v15 = vadd.f32 %v2557_v57, %v959_v14  ;;  %1966 = vmatprep.mubr.f32.mxu1 %v1012_v10 }
 0x4b6   :  { %1967 = vmatmul.mubr.f32.gmra.mrb[36].mxu1 %v1013_v12  ;;  %v1015_v18 = vmax.f32 %v965_v13, 0.0 }
 0x4b7   :  { %v1014_v16 = vmax.f32 %v960_v15, 0.0  ;;  %v1918_v17 = vpop.f32.mrb[40].mxu0  ;;  %2274 = vmatpush3.bf16.msra.mxu1 %v2240_v44  ;;  %v2260_v44 = vpack.c.bf16 %v1225_v43, %v1224_v42 }
 0x4b8   :  { %v975_v19 = vadd.f32 %v1918_v17, %v2557_v57  ;;  %v969_v20 = vpop.f32.mrb[41].mxu0  ;;  %2267 = vmatprep.subr.bf16.mxu1 %v2538_v47 }
 0x4b9   :  { %v970_v21 = vadd.f32 %v2557_v57, %v969_v20  ;;  %1969 = vmatprep.mubr.f32.mxu1 %v1014_v16  ;;  %2261 = vmatprep.subr.bf16.mxu0 %v2260_v44 }
 0x4ba   :  { %1970 = vmatmul.mubr.f32.gmra.mrb[38].mxu1 %v1015_v18  ;;  %v1017_v24 = vmax.f32 %v975_v19, 0.0  ;;  %2263 = vmatpush3.bf16.msra.mxu0 %v2260_v44 }
 0x4bb   :  { %v1016_v22 = vmax.f32 %v970_v21, 0.0  ;;  %v1921_v23 = vpop.f32.mrb[42].mxu0  ;;  %2275 = vmatpush3.bf16.msra.mxu1 %v2538_v47 }
 0x4bc   :  { %v985_v25 = vadd.f32 %v1921_v23, %v2557_v57  ;;  %v979_v26 = vpop.f32.mrb[43].mxu0  ;;  %2268 = vmatprep.subr.bf16.mxu1 %v2541_v50 }
 0x4bd   :  { %v980_v27 = vadd.f32 %v2557_v57, %v979_v26  ;;  %1972 = vmatprep.mubr.f32.mxu1 %v1016_v22 }
 0x4be   :  { %1973 = vmatmul.mubr.f32.gmra.mrb[40].mxu1 %v1017_v24  ;;  %v1019_v30 = vmax.f32 %v985_v25, 0.0 }
 0x4bf   :  { %v1018_v28 = vmax.f32 %v980_v27, 0.0  ;;  %v1924_v29 = vpop.f32.mrb[44].mxu0  ;;  %2276 = vmatpush3.bf16.msra.mxu1 %v2541_v50 }
 0x4c0   :  { %v995_v31 = vadd.f32 %v1924_v29, %v2557_v57  ;;  %v989_v32 = vpop.f32.mrb[45].mxu0  ;;  %2269 = vmatprep.subr.bf16.mxu1 %v2545_v53 }
 0x4c1   :  { %v990_v33 = vadd.f32 %v2557_v57, %v989_v32  ;;  %1975 = vmatprep.mubr.f32.mxu1 %v1018_v28 }
 0x4c2   :  { %1976 = vmatmul.mubr.f32.gmra.mrb[42].mxu1 %v1019_v30  ;;  %v1021_v36 = vmax.f32 %v995_v31, 0.0  ;;  %v1423_v30 = vld [vmem:[%s2610_s6] ss:$0 sm:$0xff]  ;;  %s2411_s6 = smov [#allocation10]  }
 0x4c3   :  { %v1020_v34 = vmax.f32 %v990_v33, 0.0  ;;  %v1927_v35 = vpop.f32.mrb[46].mxu0  ;;  %2277 = vmatpush3.bf16.msra.mxu1 %v2545_v53  ;;  %s1399_s0 = sshll.u32 %s2411_s6, 4  ;;  %s1400_s0 = int_to_ptr.vmem [resolvable:$true] %s1399_s0 }
 0x4c4   :  { %v1005_v37 = vadd.f32 %v1927_v35, %v2557_v57  ;;  %v999_v38 = vpop.f32.mrb[47].mxu0  ;;  %2270 = vmatprep.subr.bf16.mxu1 %v2549_v56  ;;  %s2375_s27 = scalar_lea.vmem %s1400_s0, 2048  ;;  %p2380_p5 = scmp.lt.s32.totalorder %s1400_s0, %s1400_s0 }
 0x4c5   :  { %v1000_v39 = vadd.f32 %v2557_v57, %v999_v38  ;;  %1978 = vmatprep.mubr.f32.mxu1 %v1020_v34  ;;  %p2376_p4 = scmp.ne.s32.totalorder %s1400_s0, %s2375_s27  ;;  %p2381_p6 = scmp.lt.s32.totalorder %s2375_s27, %s2375_s27 }
 0x4c6   :  { %1979 = vmatmul.mubr.f32.gmra.mrb[44].mxu1 %v1021_v36  ;;  %v1023_v41 = vmax.f32 %v1005_v37, 0.0 }
 0x4c7   :  { %v1022_v40 = vmax.f32 %v1000_v39, 0.0  ;;  %2278 = vmatpush3.bf16.msra.mxu1 %v2549_v56  ;;  %p2382_p7 = por %p2381_p6, %p2380_p5 }
 0x4c8   :  { %2271 = vmatprep.subr.bf16.mxu1 %v2260_v44 }
 0x4c9   :  { %1981 = vmatprep.mubr.f32.mxu1 %v1022_v40  ;;  %p2383_p8 = pnand %p2382_p7, %p2376_p4 }
 0x4ca   :  { %1982 = vmatmul.mubr.f32.gmra.mrb[46].mxu1 %v1023_v41 }
 0x4cb   :  { %2279 = vmatpush3.bf16.msra.mxu1 %v2260_v44 }
 0x581   :  { %v1962_v46 = vpop.f32.mrb[32].mxu1 }
 0x582   :  { %v1121_v47 = vadd.f32 %v1962_v46, %v1422_v45  ;;  %v1115_v48 = vpop.f32.mrb[33].mxu1 }
 0x583   :  { %v1116_v49 = vadd.f32 %v1422_v45, %v1115_v48 }
 0x584   :  { %v1195_v52 = vmax.f32 %v1121_v47, 0.0 }
 0x585   :  { %v1194_v50 = vmax.f32 %v1116_v49, 0.0  ;;  %v1965_v51 = vpop.f32.mrb[34].mxu1 }
 0x586   :  { %v1131_v53 = vadd.f32 %v1965_v51, %v1422_v45  ;;  %v1125_v54 = vpop.f32.mrb[35].mxu1 }
 0x587   :  { %v1126_v55 = vadd.f32 %v1422_v45, %v1125_v54  ;;  %2016 = vmatprep.mubr.f32.mxu0 %v1194_v50 }
 0x588   :  { %2017 = vmatmul.mubr.f32.vlgmr.msra.gmra.mrb[48].mxu0 %v1195_v52  ;;  %v1197_v58 = vmax.f32 %v1131_v53, 0.0 }
 0x589   :  { %v1196_v56 = vmax.f32 %v1126_v55, 0.0  ;;  %v1968_v57 = vpop.f32.mrb[36].mxu1 }
 0x58a   :  { %v1141_v59 = vadd.f32 %v1968_v57, %v1422_v45  ;;  %v1135_v60 = vpop.f32.mrb[37].mxu1 }
 0x58b   :  { %v1136_v61 = vadd.f32 %v1422_v45, %v1135_v60  ;;  %2019 = vmatprep.mubr.f32.mxu0 %v1196_v56 }
 0x58c   :  { %2020 = vmatmul.mubr.f32.gmra.mrb[50].mxu0 %v1197_v58  ;;  %v1199_v0 = vmax.f32 %v1141_v59, 0.0 }
 0x58d   :  { %v1198_v62 = vmax.f32 %v1136_v61, 0.0  ;;  %v1971_v63 = vpop.f32.mrb[38].mxu1 }
 0x58e   :  { %v1151_v1 = vadd.f32 %v1971_v63, %v1422_v45  ;;  %v1145_v2 = vpop.f32.mrb[39].mxu1 }
 0x58f   :  { %v1146_v3 = vadd.f32 %v1422_v45, %v1145_v2  ;;  %2022 = vmatprep.mubr.f32.mxu0 %v1198_v62 }
 0x590   :  { %2023 = vmatmul.mubr.f32.gmra.mrb[52].mxu0 %v1199_v0  ;;  %v1201_v6 = vmax.f32 %v1151_v1, 0.0 }
 0x591   :  { %v1200_v4 = vmax.f32 %v1146_v3, 0.0  ;;  %v1974_v5 = vpop.f32.mrb[40].mxu1 }
 0x592   :  { %v1161_v7 = vadd.f32 %v1974_v5, %v1422_v45  ;;  %v1155_v8 = vpop.f32.mrb[41].mxu1 }
 0x593   :  { %v1156_v9 = vadd.f32 %v1422_v45, %v1155_v8  ;;  %2025 = vmatprep.mubr.f32.mxu0 %v1200_v4 }
 0x594   :  { %2026 = vmatmul.mubr.f32.gmra.mrb[54].mxu0 %v1201_v6  ;;  %v1203_v12 = vmax.f32 %v1161_v7, 0.0 }
 0x595   :  { %v1202_v10 = vmax.f32 %v1156_v9, 0.0  ;;  %v1977_v11 = vpop.f32.mrb[42].mxu1 }
 0x596   :  { %v1171_v13 = vadd.f32 %v1977_v11, %v1422_v45  ;;  %v1165_v14 = vpop.f32.mrb[43].mxu1 }
 0x597   :  { %v1166_v15 = vadd.f32 %v1422_v45, %v1165_v14  ;;  %2028 = vmatprep.mubr.f32.mxu1 %v1202_v10 }
 0x598   :  { %2029 = vmatmul.mubr.f32.vlgmr.msra.gmra.mrb[48].mxu1 %v1203_v12  ;;  %v1205_v18 = vmax.f32 %v1171_v13, 0.0 }
 0x599   :  { %v1204_v16 = vmax.f32 %v1166_v15, 0.0  ;;  %v1980_v17 = vpop.f32.mrb[44].mxu1 }
 0x59a   :  { %v1181_v19 = vadd.f32 %v1980_v17, %v1422_v45  ;;  %v1175_v20 = vpop.f32.mrb[45].mxu1 }
 0x59b   :  { %v1176_v21 = vadd.f32 %v1422_v45, %v1175_v20  ;;  %2031 = vmatprep.mubr.f32.mxu1 %v1204_v16 }
 0x59c   :  { %2032 = vmatmul.mubr.f32.gmra.mrb[50].mxu1 %v1205_v18  ;;  %v1207_v24 = vmax.f32 %v1181_v19, 0.0 }
 0x59d   :  { %v1206_v22 = vmax.f32 %v1176_v21, 0.0  ;;  %v1983_v23 = vpop.f32.mrb[46].mxu1 }
 0x59e   :  { %v1191_v25 = vadd.f32 %v1983_v23, %v1422_v45  ;;  %v1185_v26 = vpop.f32.mrb[47].mxu1 }
 0x59f   :  { %v1186_v27 = vadd.f32 %v1422_v45, %v1185_v26  ;;  %2034 = vmatprep.mubr.f32.mxu1 %v1206_v22 }
 0x5a0   :  { %2035 = vmatmul.mubr.f32.gmra.mrb[52].mxu1 %v1207_v24  ;;  %v1209_v29 = vmax.f32 %v1191_v25, 0.0 }
 0x5a1   :  { %v1208_v28 = vmax.f32 %v1186_v27, 0.0 }
 0x5a3   :  { %2037 = vmatprep.mubr.f32.mxu1 %v1208_v28 }
 0x5a4   :  { %2038 = vmatmul.mubr.f32.gmra.mrb[54].mxu1 %v1209_v29 }
 0x65b   :  { %v2018_v31 = vpop.f32.mrb[48].mxu0 }
 0x65c   :  { %v1305_v32 = vadd.f32 %v2018_v31, %v1423_v30  ;;  %v1299_v33 = vpop.f32.mrb[49].mxu0 }
 0x65d   :  { %v1300_v34 = vadd.f32 %v1423_v30, %v1299_v33 }
 0x65e   :  { %1379 = vst [vmem:[#allocation10 + $0x8] sm:$0xff] %v1305_v32 }
 0x65f   :  { %1378 = vst [vmem:[#allocation10] sm:$0xff] %v1300_v34  ;;  %v2021_v35 = vpop.f32.mrb[50].mxu0 }
 0x660   :  { %v1315_v36 = vadd.f32 %v2021_v35, %v1423_v30  ;;  %v1309_v37 = vpop.f32.mrb[51].mxu0 }
 0x661   :  { %v1310_v38 = vadd.f32 %v1423_v30, %v1309_v37 }
 0x662   :  { %1381 = vst [vmem:[#allocation10 + $0x18] sm:$0xff] %v1315_v36 }
 0x663   :  { %1380 = vst [vmem:[#allocation10 + $0x10] sm:$0xff] %v1310_v38  ;;  %v2024_v39 = vpop.f32.mrb[52].mxu0 }
 0x664   :  { %v1325_v40 = vadd.f32 %v2024_v39, %v1423_v30  ;;  %v1319_v41 = vpop.f32.mrb[53].mxu0 }
 0x665   :  { %v1320_v42 = vadd.f32 %v1423_v30, %v1319_v41 }
 0x666   :  { %1383 = vst [vmem:[#allocation10 + $0x28] sm:$0xff] %v1325_v40 }
 0x667   :  { %1382 = vst [vmem:[#allocation10 + $0x20] sm:$0xff] %v1320_v42  ;;  %v2027_v43 = vpop.f32.mrb[54].mxu0 }
 0x668   :  { %v1335_v44 = vadd.f32 %v2027_v43, %v1423_v30  ;;  %v1329_v45 = vpop.f32.mrb[55].mxu0 }
 0x669   :  { %v1330_v46 = vadd.f32 %v1423_v30, %v1329_v45 }
 0x66a   :  { %1385 = vst [vmem:[#allocation10 + $0x38] sm:$0xff] %v1335_v44 }
 0x66b   :  { %1384 = vst [vmem:[#allocation10 + $0x30] sm:$0xff] %v1330_v46  ;;  %v2030_v47 = vpop.f32.mrb[48].mxu1 }
 0x66c   :  { %v1345_v48 = vadd.f32 %v2030_v47, %v1423_v30  ;;  %v1339_v49 = vpop.f32.mrb[49].mxu1 }
 0x66d   :  { %v1340_v50 = vadd.f32 %v1423_v30, %v1339_v49 }
 0x66e   :  { %1387 = vst [vmem:[#allocation10 + $0x48] sm:$0xff] %v1345_v48 }
 0x66f   :  { %1386 = vst [vmem:[#allocation10 + $0x40] sm:$0xff] %v1340_v50  ;;  %v2033_v51 = vpop.f32.mrb[50].mxu1 }
 0x670   :  { %v1355_v52 = vadd.f32 %v2033_v51, %v1423_v30  ;;  %v1349_v53 = vpop.f32.mrb[51].mxu1 }
 0x671   :  { %v1350_v54 = vadd.f32 %v1423_v30, %v1349_v53 }
 0x672   :  { %1389 = vst [vmem:[#allocation10 + $0x58] sm:$0xff] %v1355_v52 }
 0x673   :  { %1388 = vst [vmem:[#allocation10 + $0x50] sm:$0xff] %v1350_v54  ;;  %v2036_v55 = vpop.f32.mrb[52].mxu1 }
 0x674   :  { %v1365_v56 = vadd.f32 %v2036_v55, %v1423_v30  ;;  %v1359_v57 = vpop.f32.mrb[53].mxu1 }
 0x675   :  { %v1360_v58 = vadd.f32 %v1423_v30, %v1359_v57 }
 0x676   :  { %1391 = vst [vmem:[#allocation10 + $0x68] sm:$0xff] %v1365_v56 }
 0x677   :  { %1390 = vst [vmem:[#allocation10 + $0x60] sm:$0xff] %v1360_v58  ;;  %v2039_v59 = vpop.f32.mrb[54].mxu1 }
 0x678   :  { %v1375_v60 = vadd.f32 %v2039_v59, %v1423_v30  ;;  %v1369_v61 = vpop.f32.mrb[55].mxu1 }
 0x679   :  { %v1370_v62 = vadd.f32 %v1423_v30, %v1369_v61 }
 0x67a   :  { %1393 = vst [vmem:[#allocation10 + $0x78] sm:$0xff] %v1375_v60 }
 0x67b   :  { %1392 = vst [vmem:[#allocation10 + $0x70] sm:$0xff] %v1370_v62 }
 0x67c   :  { %2386 = shalt.err (!%p2383_p8)
}
 0x67d   :  { %s2387_s19 = scalar_lea.hbm %s2611_s7, 2048 }
 0x67e   :  { %p2388_p9 = scmp.ne.s32.totalorder %s2611_s7, %s2387_s19  ;;  %p2391_p10 = scmp.lt.u32.totalorder %s2387_s19, %s2611_s7 }
 0x680   :  { %p2393_p11 = pnand %p2391_p10, %p2388_p9 }
 0x682   :  { %2396 = shalt.err (!%p2393_p11)
}
 0x683   :  { %1405 = dma.vmem_to_hbm [thread:$0]  %s1400_s0, 2048, %s2611_s7, [#allocation4], %s2407_s13, %s2407_s13, %s2408_s14  }
 0x684   :  { %2403 = dma.done.wait [#allocation4], 2048  }
 0x685   :  { %2404 = vsyncadd [#allocation4], 4294965248 }
 0x686   :  { %1409 = vsyncpa [#allocation3], 1 }
 0x687   :  { %1410 = vsyncpa [#allocation6], 1 }
 0x688   :  { %1411 = vsyncpa [#allocation9], 1 }
 0x689   :  { %1412 = vsyncpa [#allocation4], 1 }

</bundles_post_ra>
